<compile_context>
chip_gen: v7x
topology: tpu7x:2x2x1
jax: 0.10.0
libtpu: 0.0.40
codegen_flags: <defaults>
</compile_context>

<pallas_src>
import jax
import jax.numpy as jnp
from jax import lax
from jax.experimental import pallas as pl
from jax.experimental.pallas import tpu as pltpu


def _round_up(x, m):
    return (x + m - 1) // m * m


# ---------------------------------------------------------------------------
# Kernel: one grid step == one block of TB timesteps of the LSTM recurrence.
# ---------------------------------------------------------------------------
def lstm_head_kernel(lastt_ref, tok_ref, gtab_ref, whh_ref, bg_ref,
                     wm_ref, bm_ref, wc_ref, bc_ref,
                     out_ref, h_sc, c_sc, acc_sc, xp_sc):
    # lastt_ref: [Bp, 1] int32 (length-1; -1 for padded batch rows)
    # tok_ref:   [TB*Bp, 1] int32 time-major token ids of this time block
    # gtab_ref:  [Vp, 4*Hp] bf16  per-token (emb @ W_ih) gate table, gate-packed (i,f,o,g)
    # whh_ref:   [Hp, 4*Hp] bf16  bg_ref: [1, 4*Hp] f32
    # wm_ref:    [Hp, Mp]  bf16   bm_ref: [1, Mp] f32
    # wc_ref:    [Mp, Op]  bf16   bc_ref: [1, Op] f32
    # out_ref:   [Bp, Op] f32 (lane-dense, written only on the last time block)
    # h_sc/c_sc/acc_sc: [Bp, Hp] f32 persistent state across grid steps
    # xp_sc:     [TB*Bp, 4*Hp] f32 input-projection spill buffer
    tblk = pl.program_id(0)
    tbxb = tok_ref.shape[0]
    bp, hp = h_sc.shape
    tb = tbxb // bp                    # timesteps in this block (static)
    vp = gtab_ref.shape[0]

    @pl.when(tblk == 0)
    def _init():
        h_sc[...] = jnp.zeros_like(h_sc)
        c_sc[...] = jnp.zeros_like(c_sc)
        acc_sc[...] = jnp.zeros_like(acc_sc)

    # Fused embedding lookup + input projection: one-hot(tok) @ (emb @ W_ih) table.
    # Exact lookup (one-hot rows select one table row), one wide MXU matmul per block.
    # Result spilled to VMEM scratch; the recurrence re-reads one [Bp,4Hp] slice/step.
    onehot = (tok_ref[...] ==
              lax.broadcasted_iota(jnp.int32, (tbxb, vp), 1)).astype(gtab_ref.dtype)
    xp_sc[...] = (jnp.dot(onehot, gtab_ref[...], preferred_element_type=jnp.float32)
                  + bg_ref[...])

    whh = whh_ref[...]                                        # bf16, VMEM-resident
    rel = lastt_ref[...] - tblk * tb                          # [Bp,1]; select h at rel == k

    def step(k, carry):
        h, c, acc = carry
        row = pl.multiple_of(k * bp, bp)
        gates = (xp_sc[pl.ds(row, bp), :]
                 + jnp.dot(h.astype(whh.dtype), whh,
                           preferred_element_type=jnp.float32))       # [Bp, 4*Hp] f32
        # Gate layout (i, f, o, g): the three sigmoid gates are contiguous -> a single
        # sigmoid over 3*Hp lanes + one tanh, instead of three separate sigmoids.
        sg = jax.nn.sigmoid(gates[:, :3 * hp])
        g_g = jnp.tanh(gates[:, 3 * hp:4 * hp])
        c = sg[:, hp:2 * hp] * c + sg[:, 0:hp] * g_g
        h = sg[:, 2 * hp:3 * hp] * jnp.tanh(c)
        acc = jnp.where(rel == k, h, acc)
        return h, c, acc

    h, c, acc = lax.fori_loop(0, tb, step,
                              (h_sc[...], c_sc[...], acc_sc[...]),
                              unroll=min(8, tb))

    h_sc[...] = h
    c_sc[...] = c
    acc_sc[...] = acc

    # MLP head + lane-dense store only once, on the last time block.
    @pl.when(tblk == pl.num_programs(0) - 1)
    def _finish():
        hidden = jnp.maximum(
            jnp.dot(acc.astype(wm_ref.dtype), wm_ref[...],
                    preferred_element_type=jnp.float32) + bm_ref[...],
            0.0)
        out_ref[...] = (jnp.dot(hidden.astype(wc_ref.dtype), wc_ref[...],
                                preferred_element_type=jnp.float32) + bc_ref[...])


# ---------------------------------------------------------------------------
# Parameters (logical shapes; padding/casting happens in the wrapper)
# ---------------------------------------------------------------------------
def init_params(key, num_embeddings, embedding_dim, encoder_dim, mlp_hidden_size,
                n_tasks, padding_idx=0):
    ks = jax.random.split(key, 8)

    def xavier(k, shape):
        limit = (6.0 / (shape[0] + shape[1])) ** 0.5
        return jax.random.uniform(k, shape, jnp.float32, -limit, limit)

    H = encoder_dim
    emb = xavier(ks[0], (num_embeddings, embedding_dim)).at[padding_idx].set(0.0)
    return {
        "embedding": emb,
        "w_ih": xavier(ks[1], (embedding_dim, 4 * H)),        # gate order i, f, g, o
        "w_hh": xavier(ks[2], (H, 4 * H)),
        "b_gates": 0.01 * jax.random.normal(ks[3], (1, 4 * H), jnp.float32),  # b_ih + b_hh
        "w_mlp": xavier(ks[4], (H, mlp_hidden_size)),
        "b_mlp": 0.01 * jax.random.normal(ks[5], (1, mlp_hidden_size), jnp.float32),
        "w_cls": xavier(ks[6], (mlp_hidden_size, n_tasks * 2)),
        "b_cls": 0.01 * jax.random.normal(ks[7], (1, n_tasks * 2), jnp.float32),
    }


# ---------------------------------------------------------------------------
# Wrapper: weight packing / layout padding, pallas_call
# ---------------------------------------------------------------------------
def rnn_network_forward(tokens, lengths, params, *, time_block=64):
    B, T = tokens.shape
    V, E = params["embedding"].shape
    H = params["w_hh"].shape[0]
    M = params["w_mlp"].shape[1]
    O = params["w_cls"].shape[1]              # 2 * n_tasks

    # Lane / sublane dense padded sizes.
    Hp = _round_up(H, 128)
    Mp = _round_up(M, 128)
    Op = _round_up(O, 128)
    Bp = _round_up(B, 8)
    Vp = _round_up(V, 128)
    TB = max(1, min(time_block, T))
    Tp = _round_up(T, TB)
    n_tblocks = Tp // TB

    f32, bf16 = jnp.float32, jnp.bfloat16

    def pack_gates(w):
        # [..., 4H] in PyTorch order (i, f, g, o) -> (i, f, o, g), each gate zero-padded
        # to Hp lanes so in-kernel gate slices land on 128-lane boundaries and the three
        # sigmoid gates are contiguous.
        i, f, g, o = jnp.split(w, 4, axis=-1)
        pad = [(0, 0)] * (w.ndim - 1) + [(0, Hp - H)]
        return jnp.concatenate([jnp.pad(p, pad) for p in (i, f, o, g)], axis=-1)

    # Token -> gate-contribution table (emb @ W_ih), gate-packed, row-padded to Vp.
    # Folds the embedding lookup and input projection into a single in-kernel
    # one-hot matmul; the [B,T,E] activation tensor is never materialized in HBM.
    gtab = pack_gates(params["embedding"].astype(f32) @ params["w_ih"])     # [V, 4Hp]
    gtab = jnp.pad(gtab, ((0, Vp - V), (0, 0))).astype(bf16)                # [Vp,4Hp]

    w_hh = jnp.pad(pack_gates(params["w_hh"]), ((0, Hp - H), (0, 0))).astype(bf16)
    b_g = pack_gates(params["b_gates"]).astype(f32)                          # [1,4Hp]
    w_mlp = jnp.pad(params["w_mlp"], ((0, Hp - H), (0, Mp - M))).astype(bf16)
    b_mlp = jnp.pad(params["b_mlp"], ((0, 0), (0, Mp - M))).astype(f32)
    w_cls = jnp.pad(params["w_cls"], ((0, Mp - M), (0, Op - O))).astype(bf16)
    b_cls = jnp.pad(params["b_cls"], ((0, 0), (0, Op - O))).astype(f32)

    # Tokens: time-major, padded to [Tp, Bp] (pad token 0 == padding_idx), regrouped
    # into time blocks [n_tblocks, TB*Bp, 1] streamed one slab per grid step.
    tok = jnp.transpose(tokens.astype(jnp.int32), (1, 0))
    tok = jnp.pad(tok, ((0, Tp - T), (0, Bp - B)))
    tok = tok.reshape(n_tblocks, TB * Bp, 1)

    # Last valid timestep per (padded) batch row; -1 for padded rows => never selected.
    last_t = jnp.full((Bp, 1), -1, jnp.int32)
    last_t = last_t.at[:B, 0].set(lengths.astype(jnp.int32) - 1)

    def full(shape):
        return pl.BlockSpec(shape, lambda t, _n=len(shape): (0,) * _n)

    grid_spec = pltpu.PrefetchScalarGridSpec(
        num_scalar_prefetch=0,
        grid=(n_tblocks,),
        in_specs=[
            full((Bp, 1)),                                           # last_t (resident)
            pl.BlockSpec((None, TB * Bp, 1), lambda t: (t, 0, 0)),   # tokens, streamed
            full((Vp, 4 * Hp)), full((Hp, 4 * Hp)), full((1, 4 * Hp)),
            full((Hp, Mp)), full((1, Mp)),
            full((Mp, Op)), full((1, Op)),
        ],
        out_specs=pl.BlockSpec((Bp, Op), lambda t: (0, 0)),
        scratch_shapes=[pltpu.VMEM((Bp, Hp), f32)] * 3               # h, c, acc
                       + [pltpu.VMEM((TB * Bp, 4 * Hp), f32)],       # xproj spill
    )

    # Re-derived VMEM budget (invariant weights still double-buffered by default);
    # capped at 64 MiB so it stays valid on v7x's smaller physical VMEM.
    resident_bytes = ((gtab.size + w_hh.size + w_mlp.size + w_cls.size) * 2
                      + (b_g.size + b_mlp.size + b_cls.size) * 4 + Bp * 4)
    stream_bytes = TB * Bp * 4
    scratch_bytes = (3 * Bp * Hp + TB * Bp * 4 * Hp) * 4
    vmem_limit = int(min(64 << 20,
                         max(32 << 20,
                             2 * (resident_bytes + stream_bytes) + scratch_bytes
                             + (8 << 20))))

    flops = (2 * Tp * Bp * Vp * 4 * Hp          # one-hot input projection
             + 2 * Tp * Bp * Hp * 4 * Hp        # recurrent matmuls
             + 2 * Bp * (Hp * Mp + Mp * Op))    # MLP head
    transcendentals = 5 * Tp * Bp * Hp          # 3 sigmoid + 2 tanh per element per step
    bytes_accessed = int(resident_bytes + Tp * Bp * 4 + Bp * Op * 4)

    out = pl.pallas_call(
        lstm_head_kernel,
        out_shape=jax.ShapeDtypeStruct((Bp, Op), f32),
        grid_spec=grid_spec,
        compiler_params=pltpu.CompilerParams(
            dimension_semantics=("arbitrary",),    # time axis is a sequential recurrence
            vmem_limit_bytes=vmem_limit),
        cost_estimate=pl.CostEstimate(flops=int(flops),
                                      transcendentals=int(transcendentals),
                                      bytes_accessed=bytes_accessed),
    )(last_t, tok, gtab, w_hh, b_g, w_mlp, b_mlp, w_cls, b_cls)

    n_tasks = O // 2
    return out[:B, :O].reshape(B, 2, n_tasks)     # matches output.view(-1, 2, n_tasks)


# ---------------------------------------------------------------------------
# Pure-JAX reference (f32 everywhere) for a correctness check
# ---------------------------------------------------------------------------
def rnn_network_ref(tokens, lengths, params):
    emb = params["embedding"][tokens].astype(jnp.float32)   # [B, T, E]
    B, T, _ = emb.shape
    H = params["w_hh"].shape[0]
    h = jnp.zeros((B, H), jnp.float32)
    c = jnp.zeros((B, H), jnp.float32)
    acc = jnp.zeros((B, H), jnp.float32)
    for t in range(T):
        gates = emb[:, t, :] @ params["w_ih"] + h @ params["w_hh"] + params["b_gates"]
        i_g = jax.nn.sigmoid(gates[:, 0 * H:1 * H])
        f_g = jax.nn.sigmoid(gates[:, 1 * H:2 * H])
        g_g = jnp.tanh(gates[:, 2 * H:3 * H])
        o_g = jax.nn.sigmoid(gates[:, 3 * H:4 * H])
        c = f_g * c + i_g * g_g
        h = o_g * jnp.tanh(c)
        acc = jnp.where((lengths - 1)[:, None] == t, h, acc)
    hidden = jnp.maximum(acc @ params["w_mlp"] + params["b_mlp"], 0.0)
    out = hidden @ params["w_cls"] + params["b_cls"]
    return out.reshape(B, 2, out.shape[1] // 2)


if __name__ == "__main__":
    num_embeddings = 50
    embedding_dim = 32
    encoder_dim = 32        # LSTM hidden size
    mlp_hidden_size = 32
    n_tasks = 4
    B, T = 2, 8

    key = jax.random.PRNGKey(0)
    k_par, k_tok = jax.random.split(key, 2)
    params = init_params(k_par, num_embeddings, embedding_dim, encoder_dim,
                         mlp_hidden_size, n_tasks)

    tokens = jax.random.randint(k_tok, (B, T), 1, num_embeddings, dtype=jnp.int32)
    lengths = jnp.array([T, 5], dtype=jnp.int32)   # padded-sequence lengths

    # time_block=4 -> grid of 2 time blocks, exercising state carry across grid steps.
    out = rnn_network_forward(tokens, lengths, params, time_block=4)
    out = jax.block_until_ready(out)

    assert out.shape == (B, 2, n_tasks)
    assert not bool(jnp.isnan(out).any())

    ref = rnn_network_ref(tokens, lengths, params)
    assert bool(jnp.allclose(out, ref, atol=5e-2, rtol=5e-2)), (out, ref)

    print("KERNEL_OK")
</pallas_src>

<mosaic_0001>
module attributes {stable_mosaic.version = 11 : i64} {
  func.func @lstm_head_kernel(%arg0: i32, %arg1: memref<8x1xi32, #tpu.memory_space<vmem>>, %arg2: memref<1x32x1xi32, #tpu.memory_space<vmem>>, %arg3: memref<128x512xbf16, #tpu.memory_space<vmem>>, %arg4: memref<128x512xbf16, #tpu.memory_space<vmem>>, %arg5: memref<1x512xf32, #tpu.memory_space<vmem>>, %arg6: memref<128x128xbf16, #tpu.memory_space<vmem>>, %arg7: memref<1x128xf32, #tpu.memory_space<vmem>>, %arg8: memref<128x128xbf16, #tpu.memory_space<vmem>>, %arg9: memref<1x128xf32, #tpu.memory_space<vmem>>, %arg10: memref<8x128xf32, #tpu.memory_space<vmem>>, %arg11: memref<8x128xf32, #tpu.memory_space<vmem>>, %arg12: memref<8x128xf32, #tpu.memory_space<vmem>>, %arg13: memref<8x128xf32, #tpu.memory_space<vmem>>, %arg14: memref<32x512xf32, #tpu.memory_space<vmem>>) attributes {dimension_semantics = [#tpu.dimension_semantics<arbitrary>], iteration_bounds = array<i64: 2>, scalar_prefetch = 0 : i64, scratch_operands = 4 : i64, tpu.core_type = #tpu.core_type<tc>, window_params = [{pipeline_mode = #tpu.pipeline_mode<synchronous>, transform_indices = @transform_0, window_bounds = array<i64: 8, 1>}, {transform_indices = @transform_1, window_bounds = array<i64: 1, 32, 1>}, {pipeline_mode = #tpu.pipeline_mode<synchronous>, transform_indices = @transform_2, window_bounds = array<i64: 128, 512>}, {pipeline_mode = #tpu.pipeline_mode<synchronous>, transform_indices = @transform_3, window_bounds = array<i64: 128, 512>}, {pipeline_mode = #tpu.pipeline_mode<synchronous>, transform_indices = @transform_4, window_bounds = array<i64: 1, 512>}, {pipeline_mode = #tpu.pipeline_mode<synchronous>, transform_indices = @transform_5, window_bounds = array<i64: 128, 128>}, {pipeline_mode = #tpu.pipeline_mode<synchronous>, transform_indices = @transform_6, window_bounds = array<i64: 1, 128>}, {pipeline_mode = #tpu.pipeline_mode<synchronous>, transform_indices = @transform_7, window_bounds = array<i64: 128, 128>}, {pipeline_mode = #tpu.pipeline_mode<synchronous>, transform_indices = @transform_8, window_bounds = array<i64: 1, 128>}, {pipeline_mode = #tpu.pipeline_mode<synchronous>, transform_indices = @transform_9, window_bounds = array<i64: 8, 128>}]} {
    %c0_i32 = arith.constant 0 : i32
    %0 = arith.cmpi eq, %arg0, %c0_i32 : i32
    %1 = arith.extui %0 : i1 to i32
    %c0_i32_0 = arith.constant 0 : i32
    %2 = arith.cmpi ne, %1, %c0_i32_0 : i32
    scf.if %2 {
      %cst_44 = arith.constant 0.000000e+00 : f32
      %143 = vector.broadcast %cst_44 : f32 to vector<8x128xf32>
      %c0_45 = arith.constant 0 : index
      %c0_46 = arith.constant 0 : index
      %144 = vector.load %arg11[%c0_45, %c0_46] : memref<8x128xf32, #tpu.memory_space<vmem>>, vector<8x128xf32>
      tpu.vector_store %arg11[%c0_45, %c0_46], %143 {strides = array<i32>} : memref<8x128xf32, #tpu.memory_space<vmem>>, vector<8x128xf32>,
      %cst_47 = arith.constant 0.000000e+00 : f32
      %145 = vector.broadcast %cst_47 : f32 to vector<8x128xf32>
      %c0_48 = arith.constant 0 : index
      %c0_49 = arith.constant 0 : index
      %146 = vector.load %arg12[%c0_48, %c0_49] : memref<8x128xf32, #tpu.memory_space<vmem>>, vector<8x128xf32>
      tpu.vector_store %arg12[%c0_48, %c0_49], %145 {strides = array<i32>} : memref<8x128xf32, #tpu.memory_space<vmem>>, vector<8x128xf32>,
      %cst_50 = arith.constant 0.000000e+00 : f32
      %147 = vector.broadcast %cst_50 : f32 to vector<8x128xf32>
      %c0_51 = arith.constant 0 : index
      %c0_52 = arith.constant 0 : index
      %148 = vector.load %arg13[%c0_51, %c0_52] : memref<8x128xf32, #tpu.memory_space<vmem>>, vector<8x128xf32>
      tpu.vector_store %arg13[%c0_51, %c0_52], %147 {strides = array<i32>} : memref<8x128xf32, #tpu.memory_space<vmem>>, vector<8x128xf32>,
    } else {
    }
    %c0 = arith.constant 0 : index
    %c0_1 = arith.constant 0 : index
    %c0_2 = arith.constant 0 : index
    %3 = vector.load %arg2[%c0, %c0_1, %c0_2] : memref<1x32x1xi32, #tpu.memory_space<vmem>>, vector<1x32x1xi32>
    %4 = vector.shape_cast %3 : vector<1x32x1xi32> to vector<32x1xi32>
    %5 = tpu.iota {dimensions = array<i32: 1>} : vector<32x128xi32>
    %6 = vector.broadcast %4 : vector<32x1xi32> to vector<32x128xi32>
    %7 = arith.cmpi eq, %6, %5 : vector<32x128xi32>
    %8 = arith.extui %7 : vector<32x128xi1> to vector<32x128xi32>
    %9 = arith.sitofp %8 : vector<32x128xi32> to vector<32x128xf32>
    %10 = arith.truncf %9 : vector<32x128xf32> to vector<32x128xbf16>
    %c0_3 = arith.constant 0 : index
    %c0_4 = arith.constant 0 : index
    %11 = vector.load %arg3[%c0_3, %c0_4] : memref<128x512xbf16, #tpu.memory_space<vmem>>, vector<128x512xbf16>
    %cst = arith.constant dense<0.000000e+00> : vector<32x512xf32>
    %12 = tpu.matmul %10, %11, %cst {dimension_numbers = #tpu.dot_dimension_numbers<[1], [0], [0], [1], [0, 0, 1, 1], [], []>} : vector<32x128xbf16>, vector<128x512xbf16>, vector<32x512xf32> -> vector<32x512xf32>
    %c0_5 = arith.constant 0 : index
    %c0_6 = arith.constant 0 : index
    %13 = vector.load %arg5[%c0_5, %c0_6] : memref<1x512xf32, #tpu.memory_space<vmem>>, vector<1x512xf32>
    %14 = vector.broadcast %13 : vector<1x512xf32> to vector<32x512xf32>
    %15 = arith.addf %12, %14 : vector<32x512xf32>
    %c0_7 = arith.constant 0 : index
    %c0_8 = arith.constant 0 : index
    %16 = vector.load %arg14[%c0_7, %c0_8] : memref<32x512xf32, #tpu.memory_space<vmem>>, vector<32x512xf32>
    tpu.vector_store %arg14[%c0_7, %c0_8], %15 {strides = array<i32>} : memref<32x512xf32, #tpu.memory_space<vmem>>, vector<32x512xf32>,
    %c0_9 = arith.constant 0 : index
    %c0_10 = arith.constant 0 : index
    %17 = vector.load %arg4[%c0_9, %c0_10] : memref<128x512xbf16, #tpu.memory_space<vmem>>, vector<128x512xbf16>
    %c0_11 = arith.constant 0 : index
    %c0_12 = arith.constant 0 : index
    %18 = vector.load %arg1[%c0_11, %c0_12] : memref<8x1xi32, #tpu.memory_space<vmem>>, vector<8x1xi32>
    %c4_i32 = arith.constant 4 : i32
    %19 = arith.muli %arg0, %c4_i32 : i32
    %20 = vector.broadcast %19 : i32 to vector<8x1xi32>
    %21 = arith.subi %18, %20 : vector<8x1xi32>
    %c0_13 = arith.constant 0 : index
    %c0_14 = arith.constant 0 : index
    %22 = vector.load %arg11[%c0_13, %c0_14] : memref<8x128xf32, #tpu.memory_space<vmem>>, vector<8x128xf32>
    %c0_15 = arith.constant 0 : index
    %c0_16 = arith.constant 0 : index
    %23 = vector.load %arg12[%c0_15, %c0_16] : memref<8x128xf32, #tpu.memory_space<vmem>>, vector<8x128xf32>
    %c0_17 = arith.constant 0 : index
    %c0_18 = arith.constant 0 : index
    %24 = vector.load %arg13[%c0_17, %c0_18] : memref<8x128xf32, #tpu.memory_space<vmem>>, vector<8x128xf32>
    %c0_i32_19 = arith.constant 0 : i32
    %c8_i32 = arith.constant 8 : i32
    %25 = arith.muli %c0_i32_19, %c8_i32 : i32
    %26 = tpu.assume_multiple %25, 8 : i32
    %27 = arith.index_cast %26 : i32 to index
    %c0_20 = arith.constant 0 : index
    %28 = vector.load %arg14[%27, %c0_20] : memref<32x512xf32, #tpu.memory_space<vmem>>, vector<8x512xf32>
    %29 = arith.truncf %22 : vector<8x128xf32> to vector<8x128xbf16>
    %cst_21 = arith.constant dense<0.000000e+00> : vector<8x512xf32>
    %30 = tpu.matmul %29, %17, %cst_21 {dimension_numbers = #tpu.dot_dimension_numbers<[1], [0], [0], [1], [0, 0, 1, 1], [], []>} : vector<8x128xbf16>, vector<128x512xbf16>, vector<8x512xf32> -> vector<8x512xf32>
    %31 = arith.addf %28, %30 : vector<8x512xf32>
    %32 = vector.extract_strided_slice %31 {offsets = [0, 0], sizes = [8, 384], strides = [1, 1]} : vector<8x512xf32> to vector<8x384xf32>
    %33 = arith.negf %32 : vector<8x384xf32>
    %34 = math.exp %33 : vector<8x384xf32>
    %cst_22 = arith.constant 1.000000e+00 : f32
    %35 = vector.broadcast %cst_22 : f32 to vector<8x384xf32>
    %36 = arith.addf %35, %34 : vector<8x384xf32>
    %37 = arith.divf %35, %36 : vector<8x384xf32>
    %38 = vector.extract_strided_slice %31 {offsets = [0, 384], sizes = [8, 128], strides = [1, 1]} : vector<8x512xf32> to vector<8x128xf32>
    %39 = math.tanh %38 : vector<8x128xf32>
    %40 = vector.extract_strided_slice %37 {offsets = [0, 128], sizes = [8, 128], strides = [1, 1]} : vector<8x384xf32> to vector<8x128xf32>
    %41 = arith.mulf %40, %23 : vector<8x128xf32>
    %42 = vector.extract_strided_slice %37 {offsets = [0, 0], sizes = [8, 128], strides = [1, 1]} : vector<8x384xf32> to vector<8x128xf32>
    %43 = arith.mulf %42, %39 : vector<8x128xf32>
    %44 = arith.addf %41, %43 : vector<8x128xf32>
    %45 = vector.extract_strided_slice %37 {offsets = [0, 256], sizes = [8, 128], strides = [1, 1]} : vector<8x384xf32> to vector<8x128xf32>
    %46 = math.tanh %44 : vector<8x128xf32>
    %47 = arith.mulf %45, %46 : vector<8x128xf32>
    %48 = vector.broadcast %c0_i32_19 : i32 to vector<8x1xi32>
    %49 = arith.cmpi eq, %21, %48 : vector<8x1xi32>
    %50 = vector.shape_cast %49 : vector<8x1xi1> to vector<8x1xi1>
    %51 = vector.broadcast %50 : vector<8x1xi1> to vector<8x128xi1>
    %52 = arith.select %51, %47, %24 : vector<8x128xi1>, vector<8x128xf32>
    %c1_i32 = arith.constant 1 : i32
    %c8_i32_23 = arith.constant 8 : i32
    %53 = arith.muli %c1_i32, %c8_i32_23 : i32
    %54 = tpu.assume_multiple %53, 8 : i32
    %55 = arith.index_cast %54 : i32 to index
    %c0_24 = arith.constant 0 : index
    %56 = vector.load %arg14[%55, %c0_24] : memref<32x512xf32, #tpu.memory_space<vmem>>, vector<8x512xf32>
    %57 = arith.truncf %47 : vector<8x128xf32> to vector<8x128xbf16>
    %cst_25 = arith.constant dense<0.000000e+00> : vector<8x512xf32>
    %58 = tpu.matmul %57, %17, %cst_25 {dimension_numbers = #tpu.dot_dimension_numbers<[1], [0], [0], [1], [0, 0, 1, 1], [], []>} : vector<8x128xbf16>, vector<128x512xbf16>, vector<8x512xf32> -> vector<8x512xf32>
    %59 = arith.addf %56, %58 : vector<8x512xf32>
    %60 = vector.extract_strided_slice %59 {offsets = [0, 0], sizes = [8, 384], strides = [1, 1]} : vector<8x512xf32> to vector<8x384xf32>
    %61 = arith.negf %60 : vector<8x384xf32>
    %62 = math.exp %61 : vector<8x384xf32>
    %cst_26 = arith.constant 1.000000e+00 : f32
    %63 = vector.broadcast %cst_26 : f32 to vector<8x384xf32>
    %64 = arith.addf %63, %62 : vector<8x384xf32>
    %65 = arith.divf %63, %64 : vector<8x384xf32>
    %66 = vector.extract_strided_slice %59 {offsets = [0, 384], sizes = [8, 128], strides = [1, 1]} : vector<8x512xf32> to vector<8x128xf32>
    %67 = math.tanh %66 : vector<8x128xf32>
    %68 = vector.extract_strided_slice %65 {offsets = [0, 128], sizes = [8, 128], strides = [1, 1]} : vector<8x384xf32> to vector<8x128xf32>
    %69 = arith.mulf %68, %44 : vector<8x128xf32>
    %70 = vector.extract_strided_slice %65 {offsets = [0, 0], sizes = [8, 128], strides = [1, 1]} : vector<8x384xf32> to vector<8x128xf32>
    %71 = arith.mulf %70, %67 : vector<8x128xf32>
    %72 = arith.addf %69, %71 : vector<8x128xf32>
    %73 = vector.extract_strided_slice %65 {offsets = [0, 256], sizes = [8, 128], strides = [1, 1]} : vector<8x384xf32> to vector<8x128xf32>
    %74 = math.tanh %72 : vector<8x128xf32>
    %75 = arith.mulf %73, %74 : vector<8x128xf32>
    %76 = vector.broadcast %c1_i32 : i32 to vector<8x1xi32>
    %77 = arith.cmpi eq, %21, %76 : vector<8x1xi32>
    %78 = vector.shape_cast %77 : vector<8x1xi1> to vector<8x1xi1>
    %79 = vector.broadcast %78 : vector<8x1xi1> to vector<8x128xi1>
    %80 = arith.select %79, %75, %52 : vector<8x128xi1>, vector<8x128xf32>
    %c2_i32 = arith.constant 2 : i32
    %c8_i32_27 = arith.constant 8 : i32
    %81 = arith.muli %c2_i32, %c8_i32_27 : i32
    %82 = tpu.assume_multiple %81, 8 : i32
    %83 = arith.index_cast %82 : i32 to index
    %c0_28 = arith.constant 0 : index
    %84 = vector.load %arg14[%83, %c0_28] : memref<32x512xf32, #tpu.memory_space<vmem>>, vector<8x512xf32>
    %85 = arith.truncf %75 : vector<8x128xf32> to vector<8x128xbf16>
    %cst_29 = arith.constant dense<0.000000e+00> : vector<8x512xf32>
    %86 = tpu.matmul %85, %17, %cst_29 {dimension_numbers = #tpu.dot_dimension_numbers<[1], [0], [0], [1], [0, 0, 1, 1], [], []>} : vector<8x128xbf16>, vector<128x512xbf16>, vector<8x512xf32> -> vector<8x512xf32>
    %87 = arith.addf %84, %86 : vector<8x512xf32>
    %88 = vector.extract_strided_slice %87 {offsets = [0, 0], sizes = [8, 384], strides = [1, 1]} : vector<8x512xf32> to vector<8x384xf32>
    %89 = arith.negf %88 : vector<8x384xf32>
    %90 = math.exp %89 : vector<8x384xf32>
    %cst_30 = arith.constant 1.000000e+00 : f32
    %91 = vector.broadcast %cst_30 : f32 to vector<8x384xf32>
    %92 = arith.addf %91, %90 : vector<8x384xf32>
    %93 = arith.divf %91, %92 : vector<8x384xf32>
    %94 = vector.extract_strided_slice %87 {offsets = [0, 384], sizes = [8, 128], strides = [1, 1]} : vector<8x512xf32> to vector<8x128xf32>
    %95 = math.tanh %94 : vector<8x128xf32>
    %96 = vector.extract_strided_slice %93 {offsets = [0, 128], sizes = [8, 128], strides = [1, 1]} : vector<8x384xf32> to vector<8x128xf32>
    %97 = arith.mulf %96, %72 : vector<8x128xf32>
    %98 = vector.extract_strided_slice %93 {offsets = [0, 0], sizes = [8, 128], strides = [1, 1]} : vector<8x384xf32> to vector<8x128xf32>
    %99 = arith.mulf %98, %95 : vector<8x128xf32>
    %100 = arith.addf %97, %99 : vector<8x128xf32>
    %101 = vector.extract_strided_slice %93 {offsets = [0, 256], sizes = [8, 128], strides = [1, 1]} : vector<8x384xf32> to vector<8x128xf32>
    %102 = math.tanh %100 : vector<8x128xf32>
    %103 = arith.mulf %101, %102 : vector<8x128xf32>
    %104 = vector.broadcast %c2_i32 : i32 to vector<8x1xi32>
    %105 = arith.cmpi eq, %21, %104 : vector<8x1xi32>
    %106 = vector.shape_cast %105 : vector<8x1xi1> to vector<8x1xi1>
    %107 = vector.broadcast %106 : vector<8x1xi1> to vector<8x128xi1>
    %108 = arith.select %107, %103, %80 : vector<8x128xi1>, vector<8x128xf32>
    %c3_i32 = arith.constant 3 : i32
    %c8_i32_31 = arith.constant 8 : i32
    %109 = arith.muli %c3_i32, %c8_i32_31 : i32
    %110 = tpu.assume_multiple %109, 8 : i32
    %111 = arith.index_cast %110 : i32 to index
    %c0_32 = arith.constant 0 : index
    %112 = vector.load %arg14[%111, %c0_32] : memref<32x512xf32, #tpu.memory_space<vmem>>, vector<8x512xf32>
    %113 = arith.truncf %103 : vector<8x128xf32> to vector<8x128xbf16>
    %cst_33 = arith.constant dense<0.000000e+00> : vector<8x512xf32>
    %114 = tpu.matmul %113, %17, %cst_33 {dimension_numbers = #tpu.dot_dimension_numbers<[1], [0], [0], [1], [0, 0, 1, 1], [], []>} : vector<8x128xbf16>, vector<128x512xbf16>, vector<8x512xf32> -> vector<8x512xf32>
    %115 = arith.addf %112, %114 : vector<8x512xf32>
    %116 = vector.extract_strided_slice %115 {offsets = [0, 0], sizes = [8, 384], strides = [1, 1]} : vector<8x512xf32> to vector<8x384xf32>
    %117 = arith.negf %116 : vector<8x384xf32>
    %118 = math.exp %117 : vector<8x384xf32>
    %cst_34 = arith.constant 1.000000e+00 : f32
    %119 = vector.broadcast %cst_34 : f32 to vector<8x384xf32>
    %120 = arith.addf %119, %118 : vector<8x384xf32>
    %121 = arith.divf %119, %120 : vector<8x384xf32>
    %122 = vector.extract_strided_slice %115 {offsets = [0, 384], sizes = [8, 128], strides = [1, 1]} : vector<8x512xf32> to vector<8x128xf32>
    %123 = math.tanh %122 : vector<8x128xf32>
    %124 = vector.extract_strided_slice %121 {offsets = [0, 128], sizes = [8, 128], strides = [1, 1]} : vector<8x384xf32> to vector<8x128xf32>
    %125 = arith.mulf %124, %100 : vector<8x128xf32>
    %126 = vector.extract_strided_slice %121 {offsets = [0, 0], sizes = [8, 128], strides = [1, 1]} : vector<8x384xf32> to vector<8x128xf32>
    %127 = arith.mulf %126, %123 : vector<8x128xf32>
    %128 = arith.addf %125, %127 : vector<8x128xf32>
    %129 = vector.extract_strided_slice %121 {offsets = [0, 256], sizes = [8, 128], strides = [1, 1]} : vector<8x384xf32> to vector<8x128xf32>
    %130 = math.tanh %128 : vector<8x128xf32>
    %131 = arith.mulf %129, %130 : vector<8x128xf32>
    %132 = vector.broadcast %c3_i32 : i32 to vector<8x1xi32>
    %133 = arith.cmpi eq, %21, %132 : vector<8x1xi32>
    %134 = vector.shape_cast %133 : vector<8x1xi1> to vector<8x1xi1>
    %135 = vector.broadcast %134 : vector<8x1xi1> to vector<8x128xi1>
    %136 = arith.select %135, %131, %108 : vector<8x128xi1>, vector<8x128xf32>
    %c4_i32_35 = arith.constant 4 : i32
    %c0_36 = arith.constant 0 : index
    %c0_37 = arith.constant 0 : index
    %137 = vector.load %arg11[%c0_36, %c0_37] : memref<8x128xf32, #tpu.memory_space<vmem>>, vector<8x128xf32>
    tpu.vector_store %arg11[%c0_36, %c0_37], %131 {strides = array<i32>} : memref<8x128xf32, #tpu.memory_space<vmem>>, vector<8x128xf32>,
    %c0_38 = arith.constant 0 : index
    %c0_39 = arith.constant 0 : index
    %138 = vector.load %arg12[%c0_38, %c0_39] : memref<8x128xf32, #tpu.memory_space<vmem>>, vector<8x128xf32>
    tpu.vector_store %arg12[%c0_38, %c0_39], %128 {strides = array<i32>} : memref<8x128xf32, #tpu.memory_space<vmem>>, vector<8x128xf32>,
    %c0_40 = arith.constant 0 : index
    %c0_41 = arith.constant 0 : index
    %139 = vector.load %arg13[%c0_40, %c0_41] : memref<8x128xf32, #tpu.memory_space<vmem>>, vector<8x128xf32>
    tpu.vector_store %arg13[%c0_40, %c0_41], %136 {strides = array<i32>} : memref<8x128xf32, #tpu.memory_space<vmem>>, vector<8x128xf32>,
    %c1_i32_42 = arith.constant 1 : i32
    %140 = arith.cmpi eq, %arg0, %c1_i32_42 : i32
    %141 = arith.extui %140 : i1 to i32
    %c0_i32_43 = arith.constant 0 : i32
    %142 = arith.cmpi ne, %141, %c0_i32_43 : i32
    scf.if %142 {
      %143 = arith.truncf %136 : vector<8x128xf32> to vector<8x128xbf16>
      %c0_44 = arith.constant 0 : index
      %c0_45 = arith.constant 0 : index
      %144 = vector.load %arg6[%c0_44, %c0_45] : memref<128x128xbf16, #tpu.memory_space<vmem>>, vector<128x128xbf16>
      %cst_46 = arith.constant dense<0.000000e+00> : vector<8x128xf32>
      %145 = tpu.matmul %143, %144, %cst_46 {dimension_numbers = #tpu.dot_dimension_numbers<[1], [0], [0], [1], [0, 0, 1, 1], [], []>} : vector<8x128xbf16>, vector<128x128xbf16>, vector<8x128xf32> -> vector<8x128xf32>
      %c0_47 = arith.constant 0 : index
      %c0_48 = arith.constant 0 : index
      %146 = vector.load %arg7[%c0_47, %c0_48] : memref<1x128xf32, #tpu.memory_space<vmem>>, vector<1x128xf32>
      %147 = vector.broadcast %146 : vector<1x128xf32> to vector<8x128xf32>
      %148 = arith.addf %145, %147 : vector<8x128xf32>
      %cst_49 = arith.constant 0.000000e+00 : f32
      %149 = vector.broadcast %cst_49 : f32 to vector<8x128xf32>
      %150 = arith.maximumf %148, %149 : vector<8x128xf32>
      %151 = arith.truncf %150 : vector<8x128xf32> to vector<8x128xbf16>
      %c0_50 = arith.constant 0 : index
      %c0_51 = arith.constant 0 : index
      %152 = vector.load %arg8[%c0_50, %c0_51] : memref<128x128xbf16, #tpu.memory_space<vmem>>, vector<128x128xbf16>
      %cst_52 = arith.constant dense<0.000000e+00> : vector<8x128xf32>
      %153 = tpu.matmul %151, %152, %cst_52 {dimension_numbers = #tpu.dot_dimension_numbers<[1], [0], [0], [1], [0, 0, 1, 1], [], []>} : vector<8x128xbf16>, vector<128x128xbf16>, vector<8x128xf32> -> vector<8x128xf32>
      %c0_53 = arith.constant 0 : index
      %c0_54 = arith.constant 0 : index
      %154 = vector.load %arg9[%c0_53, %c0_54] : memref<1x128xf32, #tpu.memory_space<vmem>>, vector<1x128xf32>
      %155 = vector.broadcast %154 : vector<1x128xf32> to vector<8x128xf32>
      %156 = arith.addf %153, %155 : vector<8x128xf32>
      %c0_55 = arith.constant 0 : index
      %c0_56 = arith.constant 0 : index
      %157 = vector.load %arg10[%c0_55, %c0_56] : memref<8x128xf32, #tpu.memory_space<vmem>>, vector<8x128xf32>
      tpu.vector_store %arg10[%c0_55, %c0_56], %156 {strides = array<i32>} : memref<8x128xf32, #tpu.memory_space<vmem>>, vector<8x128xf32>,
    } else {
    }
    return
  }
  func.func @transform_0(%arg0: i32) -> (i32, i32) {
    %c0_i32 = arith.constant 0 : i32
    %c0_i32_0 = arith.constant 0 : i32
    %c0_i32_1 = arith.constant 0 : i32
    return %c0_i32, %c0_i32_0 : i32, i32
  }
  func.func @transform_1(%arg0: i32) -> (i32, i32, i32) {
    %c0_i32 = arith.constant 0 : i32
    %c0_i32_0 = arith.constant 0 : i32
    %c0_i32_1 = arith.constant 0 : i32
    return %arg0, %c0_i32, %c0_i32_0 : i32, i32, i32
  }
  func.func @transform_2(%arg0: i32) -> (i32, i32) {
    %c0_i32 = arith.constant 0 : i32
    %c0_i32_0 = arith.constant 0 : i32
    %c0_i32_1 = arith.constant 0 : i32
    return %c0_i32, %c0_i32_0 : i32, i32
  }
  func.func @transform_3(%arg0: i32) -> (i32, i32) {
    %c0_i32 = arith.constant 0 : i32
    %c0_i32_0 = arith.constant 0 : i32
    %c0_i32_1 = arith.constant 0 : i32
    return %c0_i32, %c0_i32_0 : i32, i32
  }
  func.func @transform_4(%arg0: i32) -> (i32, i32) {
    %c0_i32 = arith.constant 0 : i32
    %c0_i32_0 = arith.constant 0 : i32
    %c0_i32_1 = arith.constant 0 : i32
    return %c0_i32, %c0_i32_0 : i32, i32
  }
  func.func @transform_5(%arg0: i32) -> (i32, i32) {
    %c0_i32 = arith.constant 0 : i32
    %c0_i32_0 = arith.constant 0 : i32
    %c0_i32_1 = arith.constant 0 : i32
    return %c0_i32, %c0_i32_0 : i32, i32
  }
  func.func @transform_6(%arg0: i32) -> (i32, i32) {
    %c0_i32 = arith.constant 0 : i32
    %c0_i32_0 = arith.constant 0 : i32
    %c0_i32_1 = arith.constant 0 : i32
    return %c0_i32, %c0_i32_0 : i32, i32
  }
  func.func @transform_7(%arg0: i32) -> (i32, i32) {
    %c0_i32 = arith.constant 0 : i32
    %c0_i32_0 = arith.constant 0 : i32
    %c0_i32_1 = arith.constant 0 : i32
    return %c0_i32, %c0_i32_0 : i32, i32
  }
  func.func @transform_8(%arg0: i32) -> (i32, i32) {
    %c0_i32 = arith.constant 0 : i32
    %c0_i32_0 = arith.constant 0 : i32
    %c0_i32_1 = arith.constant 0 : i32
    return %c0_i32, %c0_i32_0 : i32, i32
  }
  func.func @transform_9(%arg0: i32) -> (i32, i32) {
    %c0_i32 = arith.constant 0 : i32
    %c0_i32_0 = arith.constant 0 : i32
    %c0_i32_1 = arith.constant 0 : i32
    return %c0_i32, %c0_i32_0 : i32, i32
  }
}

</mosaic_0001>

<bundles_post_ra>
// kernel: tpu_custom_call.1
= control target key start
LH: loop header
LB: loop body
LE: loop exit
PB: predicated region body
PF: predicated region fallthrough
CT: control target
= control target key end

     0   :  { %14 = vsyncpa [#allocation7], 0  ;;  %s2811_s0 = inlined_call_operand.vmem [shape: s32[8,1], index: 0, kind: input, shape index: {}]   ;;  %s2812_s1 = inlined_call_operand.vmem [shape: s32[2,32,1], index: 1, kind: input, shape index: {}]   ;;  %s2813_s2 = inlined_call_operand.hbm [shape: bf16[128,512], index: 2, kind: input, shape index: {}]   ;;  %s2814_s3 = inlined_call_operand.hbm [shape: bf16[128,512], index: 3, kind: input, shape index: {}]   ;;  %s2815_s4 = inlined_call_operand.vmem [shape: f32[1,512], index: 4, kind: input, shape index: {}]   ;;  %s2816_s5 = inlined_call_operand.vmem [shape: bf16[128,128], index: 5, kind: input, shape index: {}]   ;;  %s2817_s6 = inlined_call_operand.vmem [shape: f32[1,128], index: 6, kind: input, shape index: {}]   ;;  %s2818_s7 = inlined_call_operand.hbm [shape: bf16[128,128], index: 7, kind: input, shape index: {}]   ;;  %s2819_s8 = inlined_call_operand.vmem [shape: f32[1,128], index: 8, kind: input, shape index: {}]   ;;  %s2820_s9 = inlined_call_operand.hbm [shape: f32[8,128], index: 9, kind: output, shape index: {}]  }
   0x1   :  { %15 = vsyncpa [#allocation10], 0 }
   0x2   :  { %16 = vsyncpa [#allocation8], 0  ;;  %s2361_s30 = smov 0  }
   0x3 LB: > { %s2367_s10 = sadd.s32 4294967295, %s2296_s30   ;;  %p1752_p0 = scmp.ge.s32.totalorder %s2296_s30, 1  ;;  %s2296_s30 = sphi %s2361_s30, %s22_s30  }
   0x4   : > { %p242_p1 = scmp.lt.s32.totalorder %s2296_s30, 3  ;;  %p1961_p3 = scmp.eq.s32.totalorder %s2367_s10, 0 }
   0x5   : > { %s2298_s12 = smov [#allocation9]   ;;  %s2299_s14 = smov [#allocation6]  }
   0x6   : > { %p2373_p4 = pnand %p1752_p0, %p242_p1  ;;  %s270_s13 = sshll.u32 %s2298_s12, 4  ;;  %s2377_s13 = int_to_ptr.vmem [resolvable:$true] %s270_s13 }
   0x7   : > { %s257_s15 = sshll.u32 %s2299_s14, 4  ;;  %s2300_s17 = smov [#allocation11]   ;;  %s2381_s15 = int_to_ptr.vmem [resolvable:$true] %s257_s15 }
   0x8   : > { %p1951_p5 = pneg %p2373_p4  ;;  %s292_s18 = sshll.u32 %s2300_s17, 4  ;;  %s2389_s18 = int_to_ptr.vmem [resolvable:$true] %s292_s18 }
   0x9   : > { %s2168_s21 = scalar_lea.hbm %s2814_s3, 4096 }
   0xa   : > { %p2385_p6 = pnand %p1961_p3, %p1951_p5  ;;  %p2169_p7 = scmp.ne.s32.totalorder %s2814_s3, %s2168_s21 }
   0xb   : > { %p2175_p11 = scmp.lt.u32.totalorder %s2168_s21, %s2814_s3 }
   0xc   : > { %p2399_p8 = pneg %p2385_p6 }
   0xe   : > { %p2171_p9 = pnand %p2399_p8, %p2169_p7 }
  0x10   : > { %p2172_p10 = pneg %p2171_p9 }
  0x12   : > { %p2177_p12 = pnand %p2175_p11, %p2172_p10 }
  0x14   : > { %2180 = shalt.err (!%p2177_p12)
}
  0x15   : > { %s2181_s27 = scalar_lea.vmem %s2377_s13, 4096  ;;  %p2189_p5 = scmp.lt.s32.totalorder %s2377_s13, %s2377_s13 }
  0x16   : > { %p2182_p13 = scmp.ne.s32.totalorder %s2377_s13, %s2181_s27  ;;  %p2190_p2 = scmp.lt.s32.totalorder %s2181_s27, %s2181_s27 }
  0x18   : > { %p2184_p0 = pnand %p2182_p13, %p2399_p8  ;;  %p2191_p7 = por %p2190_p2, %p2189_p5 }
  0x1a   : > { %p2185_p1 = pneg %p2184_p0 }
  0x1c   : > { %p2192_p9 = pnand %p2191_p7, %p2185_p1 }
  0x1e   : > { %2195 = shalt.err (!%p2192_p9)
}
  0x1f   : > { %s2301_s28 = smov 256   ;;  %s2302_s29 = smov 16  }
  0x20   : > { %1957 = dma.hbm_to_vmem [thread:$0]  (!%p2385_p6), %s2814_s3, 4096, %s2377_s13, [#allocation10], %s2301_s28, %s2301_s28, %s2302_s29  }
  0x21   : > { %s2196_s20 = scalar_lea.hbm %s2813_s2, 4096 }
  0x22   : > { %p2197_p2 = scmp.ne.s32.totalorder %s2813_s2, %s2196_s20  ;;  %p2203_p12 = scmp.lt.u32.totalorder %s2196_s20, %s2813_s2 }
  0x24   : > { %p2199_p10 = pnand %p2197_p2, %p2399_p8 }
  0x26   : > { %p2200_p11 = pneg %p2199_p10 }
  0x28   : > { %p2205_p13 = pnand %p2203_p12, %p2200_p11 }
  0x2a   : > { %2208 = shalt.err (!%p2205_p13)
}
  0x2b   : > { %s2209_s13 = scalar_lea.vmem %s2381_s15, 4096  ;;  %p2217_p7 = scmp.lt.s32.totalorder %s2381_s15, %s2381_s15 }
  0x2c   : > { %p2210_p0 = scmp.ne.s32.totalorder %s2381_s15, %s2209_s13  ;;  %p2218_p9 = scmp.lt.s32.totalorder %s2209_s13, %s2209_s13 }
  0x2e   : > { %p2212_p1 = pnand %p2210_p0, %p2399_p8  ;;  %p2219_p2 = por %p2218_p9, %p2217_p7 }
  0x30   : > { %p2213_p5 = pneg %p2212_p1 }
  0x32   : > { %p2220_p10 = pnand %p2219_p2, %p2213_p5 }
  0x34   : > { %2223 = shalt.err (!%p2220_p10)
}
  0x35   : > { %1954 = dma.hbm_to_vmem [thread:$0]  (!%p2385_p6), %s2813_s2, 4096, %s2381_s15, [#allocation7], %s2301_s28, %s2301_s28, %s2302_s29  }
  0x36   : > { %s2224_s17 = scalar_lea.hbm %s2818_s7, 1024 }
  0x37   : > { %p2225_p11 = scmp.ne.s32.totalorder %s2818_s7, %s2224_s17  ;;  %p2231_p0 = scmp.lt.u32.totalorder %s2224_s17, %s2818_s7 }
  0x39   : > { %p2227_p12 = pnand %p2225_p11, %p2399_p8 }
  0x3b   : > { %p2228_p13 = pneg %p2227_p12 }
  0x3d   : > { %p2233_p1 = pnand %p2231_p0, %p2228_p13 }
  0x3f   : > { %2236 = shalt.err (!%p2233_p1)
}
  0x40   : > { %s2237_s15 = scalar_lea.vmem %s2389_s18, 1024  ;;  %p2245_p2 = scmp.lt.s32.totalorder %s2389_s18, %s2389_s18 }
  0x41   : > { %p2238_p5 = scmp.ne.s32.totalorder %s2389_s18, %s2237_s15  ;;  %p2246_p10 = scmp.lt.s32.totalorder %s2237_s15, %s2237_s15 }
  0x43   : > { %p2240_p7 = pnand %p2238_p5, %p2399_p8  ;;  %p2247_p11 = por %p2246_p10, %p2245_p2 }
  0x45   : > { %p2241_p9 = pneg %p2240_p7 }
  0x47   : > { %p2248_p12 = pnand %p2247_p11, %p2241_p9 }
  0x49   : > { %2251 = shalt.err (!%p2248_p12)
}
  0x4a   : > { %s2303_s28 = smov 64   ;;  %s2304_s29 = smov 4  }
  0x4b   : > { %1960 = dma.hbm_to_vmem [thread:$0]  (!%p2385_p6), %s2818_s7, 1024, %s2389_s18, [#allocation10], %s2303_s28, %s2303_s28, %s2304_s29  }
  0x4c   : > { %319 = sbr.rel (%p2373_p4) target bundleno = 1763 (0x6e3), region = 56 }
  0x53   : > { %2283 = dma.done.wait (%p1961_p3), [#allocation7], 4096  }
  0x54   : > { %2285 = vsyncadd (%p1961_p3), [#allocation7], 4294963200 }
  0x55   : > { %2287 = dma.done.wait (%p1961_p3), [#allocation10], 5120  }
  0x56   : > { %2289 = vsyncadd (%p1961_p3), [#allocation10], 4294962176  ;;  %p358_p8 = scmp.lt.s32.totalorder %s2367_s10, 1  ;;  %p2826_p4 = scmp.ne.s32.totalorder %s2367_s10, 0 }
  0x57   : > { %v2305_v0 = vmov (!%p2826_p4), 0.0  }
  0x58   : > { %s359_s16 = scalar_select %p358_p8, %s2367_s10, 1 }
  0x59   : > { %367 = sbr.rel (%p2826_p4) target bundleno = 96 (0x60), region = 72  ;;  %368 = vst [vmem:[#allocation2] sm:$0xff] (!%p2826_p4), %v2305_v0  ;;  %369 = vst [vmem:[#allocation3] sm:$0xff] (!%p2826_p4), %v2305_v0 }
  0x5a   : > { %s1876_s18 = sshll.u32 %s359_s16, 5  ;;  %370 = vst [vmem:[#allocation4] sm:$0xff] (!%p2826_p4), %v2305_v0 }
  0x5b   : > { %s362_s13 = scalar_lea.vmem %s2812_s1, %s1876_s18 }
  0x60 PF: > { %v371_v1 = vld [vmem:[%s362_s13] sm:$0xff]  ;;  %s1808_s12 = sshll.u32 %s2367_s10, 2  ;;  %v2821_v3 = vmov 0   ;;  %v372_v4 = vld [vmem:[%s362_s13 + $0x8] sm:$0xff]  ;;  %v373_v6 = vld [vmem:[%s362_s13 + $0x10] sm:$0xff]  ;;  %v375_v47 = vlaneseq  ;;  %p1853_p3 = scmp.ne.s32.totalorder %s2367_s10, 1 }
  0x61   : > { %v771_v2 = vld [vmem:[%s2811_s0] sm:$0xff]  ;;  %1990 = vset.pattern.permute.xlu0 %v2821_v3  ;;  %v773_v5 = vstv %s1808_s12  ;;  %1991 = vset.pattern.permute.xlu1 %v2821_v3  ;;  %v374_v7 = vld [vmem:[%s362_s13 + $0x18] sm:$0xff]  ;;  %v2307_v56 = vmov 1.0|1.0   ;;  %vm2309_vm14 = vmmov (!%p1853_p3), 0  }
  0x62   : > { %378 = vperm.xlu0 %1990, %v371_v1   ;;  %v774_v8 = vsub.s32 %v771_v2, %v773_v5  ;;  %384 = vperm.xlu1 %1991, %v373_v6   ;;  %v1992_v9 = vld [vmem:[#allocation6 + $0x4] ss:$16 sps:$4 sm:$0xff]   ;;  %v1994_v10 = vld [vmem:[#allocation6 + $0xc] ss:$16 sps:$4 sm:$0xff]   ;;  %v1996_v11 = vld [vmem:[#allocation6] ss:$16 sps:$4 sm:$0xff]  }
  0x63   : > { %649 = vmatprep.mubr.bf16.mxu0 %v2821_v3  ;;  %702 = vmatprep.mubr.bf16.mxu1 %v2821_v3  ;;  %v1997_v12 = vld [vmem:[#allocation6 + $0x8] ss:$16 sps:$4 sm:$0xff]   ;;  %v1998_v15 = vld [vmem:[#allocation6 + $0x24] ss:$16 sps:$4 sm:$0xff]   ;;  %v2000_v16 = vld [vmem:[#allocation6 + $0x2c] ss:$16 sps:$4 sm:$0xff]  }
  0x64   : > { %vm1056_vm0 = vcmp.eq.s32.totalorder %v774_v8, 0  ;;  %vm1181_vm1 = vcmp.eq.s32.totalorder %v774_v8, 1  ;;  %617 = vmatprep.subr.bf16.mxu0 %v1992_v9  ;;  %670 = vmatprep.subr.bf16.mxu1 %v1994_v10  ;;  %v2002_v17 = vld [vmem:[#allocation6 + $0x20] ss:$16 sps:$4 sm:$0xff]   ;;  %v2003_v18 = vld [vmem:[#allocation6 + $0x28] ss:$16 sps:$4 sm:$0xff]  }
  0x65   : > { %618 = vmatpush1.bf16.msra.mxu0 %v1996_v11  ;;  %v1057_v13 = vsel %vm1056_vm0, 1, %v2821_v3  ;;  %v1182_v14 = vsel %vm1181_vm1, 1, %v2821_v3  ;;  %671 = vmatpush1.bf16.msra.mxu1 %v1997_v12  ;;  %vm1306_vm2 = vcmp.eq.s32.totalorder %v774_v8, 2  ;;  %vm1431_vm3 = vcmp.eq.s32.totalorder %v774_v8, 3  ;;  %v2004_v19 = vld [vmem:[#allocation6 + $0x44] ss:$16 sps:$4 sm:$0xff]  }
  0x66   : > { %381 = vperm.xlu0 %1990, %v372_v4   ;;  %387 = vperm.xlu1 %1991, %v374_v7   ;;  %v2006_v20 = vld [vmem:[#allocation6 + $0x4c] ss:$16 sps:$4 sm:$0xff]   ;;  %v2008_v21 = vld [vmem:[#allocation6 + $0x40] ss:$16 sps:$4 sm:$0xff]   ;;  %v2009_v22 = vld [vmem:[#allocation6 + $0x48] ss:$16 sps:$4 sm:$0xff]  }
  0x67   : > { %619 = vmatprep.subr.bf16.mxu0 %v1998_v15  ;;  %672 = vmatprep.subr.bf16.mxu1 %v2000_v16  ;;  %v1307_v23 = vsel %vm1306_vm2, 1, %v2821_v3  ;;  %v1432_v24 = vsel %vm1431_vm3, 1, %v2821_v3  ;;  %v2010_v25 = vld [vmem:[#allocation6 + $0x64] ss:$16 sps:$4 sm:$0xff]   ;;  %v2012_v26 = vld [vmem:[#allocation6 + $0x6c] ss:$16 sps:$4 sm:$0xff]  }
  0x68   : > { %v2014_v27 = vld [vmem:[#allocation6 + $0x60] ss:$16 sps:$4 sm:$0xff]   ;;  %v2016_v28 = vld [vmem:[#allocation6 + $0x84] ss:$16 sps:$4 sm:$0xff]   ;;  %v2015_v29 = vld [vmem:[#allocation6 + $0x68] ss:$16 sps:$4 sm:$0xff]  }
  0x69   : > { %620 = vmatpush1.bf16.msra.mxu0 %v2002_v17  ;;  %673 = vmatpush1.bf16.msra.mxu1 %v2003_v18  ;;  %v2018_v30 = vld [vmem:[#allocation6 + $0x8c] ss:$16 sps:$4 sm:$0xff]   ;;  %v2020_v31 = vld [vmem:[#allocation6 + $0x80] ss:$16 sps:$4 sm:$0xff]   ;;  %v2022_v32 = vld [vmem:[#allocation6 + $0xa4] ss:$16 sps:$4 sm:$0xff]  }
  0x6a   : > { %1059 = vperm.xlu0 %1990, %v1057_v13   ;;  %1184 = vperm.xlu1 %1991, %v1182_v14   ;;  %v2021_v33 = vld [vmem:[#allocation6 + $0x88] ss:$16 sps:$4 sm:$0xff]   ;;  %v2024_v34 = vld [vmem:[#allocation6 + $0xac] ss:$16 sps:$4 sm:$0xff]   ;;  %v2026_v35 = vld [vmem:[#allocation6 + $0xa0] ss:$16 sps:$4 sm:$0xff]  }
  0x6b   : > { %621 = vmatprep.subr.bf16.mxu0 %v2004_v19  ;;  %674 = vmatprep.subr.bf16.mxu1 %v2006_v20  ;;  %v2028_v36 = vld [vmem:[#allocation6 + $0xc4] ss:$16 sps:$4 sm:$0xff]   ;;  %v2027_v37 = vld [vmem:[#allocation6 + $0xa8] ss:$16 sps:$4 sm:$0xff]   ;;  %v2030_v38 = vld [vmem:[#allocation6 + $0xcc] ss:$16 sps:$4 sm:$0xff]  }
  0x6c   : > { %v2032_v39 = vld [vmem:[#allocation6 + $0xc0] ss:$16 sps:$4 sm:$0xff]   ;;  %v2034_v40 = vld [vmem:[#allocation6 + $0xe4] ss:$16 sps:$4 sm:$0xff]   ;;  %v2033_v41 = vld [vmem:[#allocation6 + $0xc8] ss:$16 sps:$4 sm:$0xff]  }
  0x6d   : > { %622 = vmatpush1.bf16.msra.mxu0 %v2008_v21  ;;  %675 = vmatpush1.bf16.msra.mxu1 %v2009_v22  ;;  %v2036_v42 = vld [vmem:[#allocation6 + $0xec] ss:$16 sps:$4 sm:$0xff]   ;;  %v2038_v43 = vld [vmem:[#allocation6 + $0xe0] ss:$16 sps:$4 sm:$0xff]   ;;  %v2495_v44 = vld [vmem:[#allocation9 + $0x4] ss:$16 sps:$4 sm:$0xff]  }
  0x6e   : > { %1309 = vperm.xlu0 %1990, %v1307_v23   ;;  %1434 = vperm.xlu1 %1991, %v1432_v24   ;;  %v2039_v45 = vld [vmem:[#allocation6 + $0xe8] ss:$16 sps:$4 sm:$0xff]   ;;  %v2497_v46 = vld [vmem:[#allocation9 + $0xc] ss:$16 sps:$4 sm:$0xff]   ;;  %v376_v49 = vand.u32 127, %v375_v47  ;;  %v438_v23 = vshrl.u32 %v375_v47, 7 }
  0x6f   : > { %623 = vmatprep.subr.bf16.mxu0 %v2010_v25  ;;  %676 = vmatprep.subr.bf16.mxu1 %v2012_v26  ;;  %v2502_v52 = vld [vmem:[#allocation9] ss:$16 sps:$4 sm:$0xff]   ;;  %v2504_v53 = vld [vmem:[#allocation9 + $0x8] ss:$16 sps:$4 sm:$0xff]   ;;  %v2506_v54 = vld [vmem:[#allocation9 + $0x24] ss:$16 sps:$4 sm:$0xff]  }
  0x70   : > { %v2508_v55 = vld [vmem:[#allocation9 + $0x2c] ss:$16 sps:$4 sm:$0xff]   ;;  %v2512_v57 = vld [vmem:[#allocation9 + $0x20] ss:$16 sps:$4 sm:$0xff]   ;;  %v2514_v58 = vld [vmem:[#allocation9 + $0x28] ss:$16 sps:$4 sm:$0xff]  }
  0x71   : > { %624 = vmatpush1.bf16.msra.mxu0 %v2014_v27  ;;  %677 = vmatpush1.bf16.msra.mxu1 %v2015_v29  ;;  %v2518_v60 = vld [vmem:[#allocation9 + $0x44] ss:$16 sps:$4 sm:$0xff]   ;;  %v2520_v61 = vld [vmem:[#allocation9 + $0x4c] ss:$16 sps:$4 sm:$0xff]   ;;  %v2526_v62 = vld [vmem:[#allocation9 + $0x40] ss:$16 sps:$4 sm:$0xff]  }
  0x72   : > { %625 = vmatprep.subr.bf16.mxu0 %v2016_v28  ;;  %678 = vmatprep.subr.bf16.mxu1 %v2018_v30  ;;  %v2528_v63 = vld [vmem:[#allocation9 + $0x48] ss:$16 sps:$4 sm:$0xff]   ;;  %v2532_v0 = vld [vmem:[#allocation9 + $0x64] ss:$16 sps:$4 sm:$0xff]   ;;  %v2534_v1 = vld [vmem:[#allocation9 + $0x6c] ss:$16 sps:$4 sm:$0xff]  }
  0x73   : > { %v2538_v2 = vld [vmem:[#allocation9 + $0x60] ss:$16 sps:$4 sm:$0xff]   ;;  %v2540_v4 = vld [vmem:[#allocation9 + $0x68] ss:$16 sps:$4 sm:$0xff]   ;;  %v2544_v5 = vld [vmem:[#allocation9 + $0x84] ss:$16 sps:$4 sm:$0xff]  }
  0x74   : > { %v2546_v6 = vld [vmem:[#allocation9 + $0x8c] ss:$16 sps:$4 sm:$0xff]   ;;  %v2552_v7 = vld [vmem:[#allocation9 + $0x80] ss:$16 sps:$4 sm:$0xff]   ;;  %v2554_v8 = vld [vmem:[#allocation9 + $0x88] ss:$16 sps:$4 sm:$0xff]  }
  0x75   : > { %626 = vmatpush1.bf16.msra.mxu0 %v2020_v31  ;;  %679 = vmatpush1.bf16.msra.mxu1 %v2021_v33  ;;  %v2558_v9 = vld [vmem:[#allocation9 + $0xa4] ss:$16 sps:$4 sm:$0xff]   ;;  %v2560_v10 = vld [vmem:[#allocation9 + $0xac] ss:$16 sps:$4 sm:$0xff]   ;;  %v2564_v11 = vld [vmem:[#allocation9 + $0xa0] ss:$16 sps:$4 sm:$0xff]  }
  0x76   : > { %627 = vmatprep.subr.bf16.mxu0 %v2022_v32  ;;  %680 = vmatprep.subr.bf16.mxu1 %v2024_v34  ;;  %v2566_v12 = vld [vmem:[#allocation9 + $0xa8] ss:$16 sps:$4 sm:$0xff]   ;;  %v2570_v13 = vld [vmem:[#allocation9 + $0xc4] ss:$16 sps:$4 sm:$0xff]   ;;  %v2572_v14 = vld [vmem:[#allocation9 + $0xcc] ss:$16 sps:$4 sm:$0xff]  }
  0x77   : > { %v2576_v15 = vld [vmem:[#allocation9 + $0xc0] ss:$16 sps:$4 sm:$0xff]   ;;  %v2578_v16 = vld [vmem:[#allocation9 + $0xc8] ss:$16 sps:$4 sm:$0xff]   ;;  %v2582_v17 = vld [vmem:[#allocation9 + $0xe4] ss:$16 sps:$4 sm:$0xff]  }
  0x78   : > { %v2584_v18 = vld [vmem:[#allocation9 + $0xec] ss:$16 sps:$4 sm:$0xff]   ;;  %v2588_v19 = vld [vmem:[#allocation9 + $0xe0] ss:$16 sps:$4 sm:$0xff]   ;;  %v2590_v20 = vld [vmem:[#allocation9 + $0xe8] ss:$16 sps:$4 sm:$0xff]  }
  0x79   : > { %628 = vmatpush1.bf16.msra.mxu0 %v2026_v35  ;;  %681 = vmatpush1.bf16.msra.mxu1 %v2027_v37  ;;  %v775_v21 = vld [vmem:[#allocation2] sm:$0xff]  ;;  %v439_v24 = vsub.s32 0, %v438_v23  ;;  %v447_v25 = vsub.s32 2, %v438_v23  ;;  %v443_v27 = vsub.s32 1, %v438_v23  ;;  %v451_v28 = vsub.s32 3, %v438_v23 }
  0x7a   : > { %629 = vmatprep.subr.bf16.mxu0 %v2028_v36  ;;  %682 = vmatprep.subr.bf16.mxu1 %v2030_v38  ;;  %v785_v22 = vpack.c.bf16 %v775_v21, %v775_v21  ;;  %v435_v26 = vld [vmem:[%s2815_s4] sm:$0xf] }
  0x7b   : > { %v440_v29 = vrot.slane %v435_v26, %v439_v24  ;;  %v448_v30 = vrot.slane %v435_v26, %v447_v25  ;;  %v444_v31 = vrot.slane %v435_v26, %v443_v27  ;;  %v452_v32 = vrot.slane %v435_v26, %v451_v28 }
  0x7d   : > { %630 = vmatpush1.bf16.msra.mxu0 %v2032_v39  ;;  %683 = vmatpush1.bf16.msra.mxu1 %v2033_v41 }
  0x7e   : > { %631 = vmatprep.subr.bf16.mxu0 %v2034_v40  ;;  %684 = vmatprep.subr.bf16.mxu1 %v2036_v42 }
  0x81   : > { %632 = vmatpush1.bf16.msra.mxu0 %v2038_v43  ;;  %685 = vmatpush1.bf16.msra.mxu1 %v2039_v45 }
  0x82   : > { %946 = vmatprep.subr.bf16.mxu0 %v2495_v44  ;;  %987 = vmatprep.subr.bf16.mxu1 %v2497_v46 }
  0xe1   : > { %v379_v48 = vpop.permute.xlu0 %378  ;;  %v385_v50 = vpop.permute.xlu1 %384 }
  0xe2   : > { %vm389_vm4 = vcmp.eq.s32.totalorder %v379_v48, %v376_v49  ;;  %vm391_vm7 = vcmp.eq.s32.totalorder %v385_v50, %v376_v49 }
  0xe5   : > { %v382_v51 = vpop.permute.xlu0 %381  ;;  %v388_v59 = vpop.permute.xlu1 %387 }
  0xe6   : > { %vm390_vm5 = vcmp.eq.s32.totalorder %v382_v51, %v376_v49  ;;  %vm392_vm8 = vcmp.eq.s32.totalorder %v388_v59, %v376_v49 }
  0xe7   : > { %vm1800_vm6 = vmpackc.low %vm390_vm5, %vm389_vm4 }
  0xe8   : > { %1801 = vmatmul.mubr.msk.bf16.vlgmr.msra.gmra.mrb[0].mxu0 %vm1800_vm6, %v2307_v56  ;;  %1805 = vmatmul.mubr.msk.bf16.vlgmr.msra.gmra.mrb[0].mxu1 %vm1800_vm6, %v2307_v56  ;;  %vm1802_vm9 = vmpackc.low %vm392_vm8, %vm391_vm7 }
  0xe9   : > { %947 = vmatpush1.bf16.msra.mxu0 %v2502_v52  ;;  %988 = vmatpush1.bf16.msra.mxu1 %v2504_v53 }
  0xea   : > { %948 = vmatprep.subr.bf16.mxu0 %v2506_v54  ;;  %989 = vmatprep.subr.bf16.mxu1 %v2508_v55 }
  0xeb   : > { %659 = vmatprep.mubr.bf16.mxu0 %v2821_v3  ;;  %712 = vmatprep.mubr.bf16.mxu1 %v2821_v3 }
  0xed   : > { %949 = vmatpush1.bf16.msra.mxu0 %v2512_v57  ;;  %990 = vmatpush1.bf16.msra.mxu1 %v2514_v58 }
  0xee   : > { %950 = vmatprep.subr.bf16.mxu0 %v2518_v60  ;;  %991 = vmatprep.subr.bf16.mxu1 %v2520_v61 }
  0xf0   : > { %1803 = vmatmul.mubr.msk.bf16.gmra.mrb[4].mxu0 %vm1802_vm9, %v2307_v56  ;;  %1807 = vmatmul.mubr.msk.bf16.gmra.mrb[4].mxu1 %vm1802_vm9, %v2307_v56 }
  0xf1   : > { %951 = vmatpush1.bf16.msra.mxu0 %v2526_v62  ;;  %992 = vmatpush1.bf16.msra.mxu1 %v2528_v63 }
  0xf2   : > { %952 = vmatprep.subr.bf16.mxu0 %v2532_v0  ;;  %993 = vmatprep.subr.bf16.mxu1 %v2534_v1 }
  0xf3   : > { %978 = vmatprep.mubr.bf16.mxu0 %v2821_v3  ;;  %1019 = vmatprep.mubr.bf16.mxu1 %v2821_v3 }
  0xf5   : > { %953 = vmatpush1.bf16.msra.mxu0 %v2538_v2  ;;  %994 = vmatpush1.bf16.msra.mxu1 %v2540_v4 }
  0xf6   : > { %954 = vmatprep.subr.bf16.mxu0 %v2544_v5  ;;  %995 = vmatprep.subr.bf16.mxu1 %v2546_v6 }
  0xf9   : > { %955 = vmatpush1.bf16.msra.mxu0 %v2552_v7  ;;  %996 = vmatpush1.bf16.msra.mxu1 %v2554_v8 }
  0xfa   : > { %956 = vmatprep.subr.bf16.mxu0 %v2558_v9  ;;  %997 = vmatprep.subr.bf16.mxu1 %v2560_v10 }
  0xfd   : > { %957 = vmatpush1.bf16.msra.mxu0 %v2564_v11  ;;  %998 = vmatpush1.bf16.msra.mxu1 %v2566_v12 }
  0xfe   : > { %958 = vmatprep.subr.bf16.mxu0 %v2570_v13  ;;  %999 = vmatprep.subr.bf16.mxu1 %v2572_v14 }
 0x101   : > { %959 = vmatpush1.bf16.msra.mxu0 %v2576_v15  ;;  %1000 = vmatpush1.bf16.msra.mxu1 %v2578_v16 }
 0x102   : > { %960 = vmatprep.subr.bf16.mxu0 %v2582_v17  ;;  %1001 = vmatprep.subr.bf16.mxu1 %v2584_v18 }
 0x105   : > { %961 = vmatpush1.bf16.msra.mxu0 %v2588_v19  ;;  %1002 = vmatpush1.bf16.msra.mxu1 %v2590_v20 }
 0x106   : > { %1071 = vmatprep.subr.bf16.mxu0 %v2495_v44  ;;  %1112 = vmatprep.subr.bf16.mxu1 %v2497_v46 }
 0x108   : > { %979 = vmatmul.mubr.bf16.vlgmr.msra.gmra.mrb[8].mxu0 %v785_v22  ;;  %1020 = vmatmul.mubr.bf16.vlgmr.msra.gmra.mrb[8].mxu1 %v785_v22 }
 0x109   : > { %1072 = vmatpush1.bf16.msra.mxu0 %v2502_v52  ;;  %1113 = vmatpush1.bf16.msra.mxu1 %v2504_v53 }
 0x10a   : > { %1073 = vmatprep.subr.bf16.mxu0 %v2506_v54  ;;  %1114 = vmatprep.subr.bf16.mxu1 %v2508_v55 }
 0x10b   : > { %1103 = vmatprep.mubr.bf16.mxu0 %v2821_v3  ;;  %1144 = vmatprep.mubr.bf16.mxu1 %v2821_v3 }
 0x10d   : > { %1074 = vmatpush1.bf16.msra.mxu0 %v2512_v57  ;;  %1115 = vmatpush1.bf16.msra.mxu1 %v2514_v58 }
 0x10e   : > { %1075 = vmatprep.subr.bf16.mxu0 %v2518_v60  ;;  %1116 = vmatprep.subr.bf16.mxu1 %v2520_v61 }
 0x111   : > { %1076 = vmatpush1.bf16.msra.mxu0 %v2526_v62  ;;  %1117 = vmatpush1.bf16.msra.mxu1 %v2528_v63 }
 0x112   : > { %1077 = vmatprep.subr.bf16.mxu0 %v2532_v0  ;;  %1118 = vmatprep.subr.bf16.mxu1 %v2534_v1 }
 0x115   : > { %1078 = vmatpush1.bf16.msra.mxu0 %v2538_v2  ;;  %1119 = vmatpush1.bf16.msra.mxu1 %v2540_v4 }
 0x116   : > { %1079 = vmatprep.subr.bf16.mxu0 %v2544_v5  ;;  %1120 = vmatprep.subr.bf16.mxu1 %v2546_v6 }
 0x119   : > { %1080 = vmatpush1.bf16.msra.mxu0 %v2552_v7  ;;  %1121 = vmatpush1.bf16.msra.mxu1 %v2554_v8 }
 0x11a   : > { %1081 = vmatprep.subr.bf16.mxu0 %v2558_v9  ;;  %1122 = vmatprep.subr.bf16.mxu1 %v2560_v10 }
 0x11d   : > { %1082 = vmatpush1.bf16.msra.mxu0 %v2564_v11  ;;  %1123 = vmatpush1.bf16.msra.mxu1 %v2566_v12 }
 0x11e   : > { %1083 = vmatprep.subr.bf16.mxu0 %v2570_v13  ;;  %1124 = vmatprep.subr.bf16.mxu1 %v2572_v14 }
 0x121   : > { %1084 = vmatpush1.bf16.msra.mxu0 %v2576_v15  ;;  %1125 = vmatpush1.bf16.msra.mxu1 %v2578_v16 }
 0x122   : > { %1085 = vmatprep.subr.bf16.mxu0 %v2582_v17  ;;  %1126 = vmatprep.subr.bf16.mxu1 %v2584_v18 }
 0x125   : > { %1086 = vmatpush1.bf16.msra.mxu0 %v2588_v19  ;;  %1127 = vmatpush1.bf16.msra.mxu1 %v2590_v20 }
 0x126   : > { %1196 = vmatprep.subr.bf16.mxu0 %v2495_v44  ;;  %1237 = vmatprep.subr.bf16.mxu1 %v2497_v46 }
 0x1bb   : > { %v651_v33 = vpop.f32.mrb[0].mxu0  ;;  %v704_v34 = vpop.f32.mrb[0].mxu1 }
 0x1bc   : > { %v652_v35 = vadd.f32 %v651_v33, %v440_v29  ;;  %v705_v36 = vadd.f32 %v704_v34, %v448_v30  ;;  %v653_v37 = vpop.f32.mrb[1].mxu0  ;;  %v706_v38 = vpop.f32.mrb[1].mxu1 }
 0x1bd   : > { %v654_v39 = vadd.f32 %v653_v37, %v444_v31  ;;  %v707_v40 = vadd.f32 %v706_v38, %v452_v32  ;;  %v655_v41 = vpop.f32.mrb[2].mxu0  ;;  %v708_v42 = vpop.f32.mrb[2].mxu1 }
 0x1be   : > { %v2636_v43 = vadd.f32 %v655_v41, %v440_v29  ;;  %v2638_v45 = vadd.f32 %v708_v42, %v448_v30  ;;  %v657_v47 = vpop.f32.mrb[3].mxu0  ;;  %v710_v48 = vpop.f32.mrb[3].mxu1 }
 0x1bf   : > { %v2640_v49 = vadd.f32 %v657_v47, %v444_v31  ;;  %v2642_v50 = vadd.f32 %v710_v48, %v452_v32 }
 0x1c3   : > { %v661_v51 = vpop.f32.mrb[4].mxu0  ;;  %v714_v56 = vpop.f32.mrb[4].mxu1 }
 0x1c4   : > { %v2644_v59 = vadd.f32 %v661_v51, %v440_v29  ;;  %v2646_v21 = vadd.f32 %v714_v56, %v448_v30  ;;  %v663_v22 = vpop.f32.mrb[5].mxu0  ;;  %v716_v23 = vpop.f32.mrb[5].mxu1 }
 0x1c5   : > { %v2648_v24 = vadd.f32 %v663_v22, %v444_v31  ;;  %v2650_v25 = vadd.f32 %v716_v23, %v452_v32  ;;  %v665_v26 = vpop.f32.mrb[6].mxu0  ;;  %v718_v27 = vpop.f32.mrb[6].mxu1 }
 0x1c6   : > { %v2652_v28 = vadd.f32 %v665_v26, %v440_v29  ;;  %v2654_v33 = vadd.f32 %v718_v27, %v448_v30  ;;  %v667_v34 = vpop.f32.mrb[7].mxu0  ;;  %v720_v37 = vpop.f32.mrb[7].mxu1 }
 0x1c7   : > { %2827 = vst [vmem:[#allocation16_spill] sm:$0xff] %v2648_v24  ;;  %2828 = vst [vmem:[#allocation17_spill] sm:$0xff] %v2650_v25  ;;  %v2656_v38 = vadd.f32 %v667_v34, %v444_v31  ;;  %v2658_v41 = vadd.f32 %v720_v37, %v452_v32 }
 0x1db   : > { %v980_v42 = vpop.f32.mrb[8].mxu0  ;;  %v1021_v47 = vpop.f32.mrb[8].mxu1 }
 0x1dc   : > { %v1028_v48 = vadd.f32 %v980_v42, %v652_v35  ;;  %v1030_v51 = vadd.f32 %v1021_v47, %v705_v36  ;;  %v982_v56 = vpop.f32.mrb[9].mxu0  ;;  %v1023_v22 = vpop.f32.mrb[9].mxu1 }
 0x1dd   : > { %v1029_v23 = vadd.f32 %v982_v56, %v654_v39  ;;  %v1031_v3 = vadd.f32 %v1023_v22, %v707_v40  ;;  %v984_v25 = vpop.f32.mrb[10].mxu0  ;;  %v1025_v24 = vpop.f32.mrb[10].mxu1 }
 0x1de   : > { %v1841_v29 = vmul.f32 -1.442695, %v1028_v48  ;;  %v985_v26 = vpop.f32.mrb[11].mxu0  ;;  %v1026_v30 = vpop.f32.mrb[11].mxu1  ;;  %v1843_v31 = vmul.f32 -1.442695, %v1030_v51 }
 0x1df   : > { %v1842_v27 = vmul.f32 -1.442695, %v1029_v23  ;;  %v776_v25 = vld [vmem:[#allocation3] sm:$0xff] }
 0x1e0   : > { %2088 = vpow2.f32 %v1841_v29  ;;  %v2829_v29 = vmov 0  }
 0x1e1   : > { %2090 = vpow2.f32 %v1842_v27 }
 0x1e2   : > { %2092 = vtanh.f32 %v1031_v3 }
 0x1e3   : > { %2094 = vpow2.f32 %v1843_v31 }
 0x1ea   : > { %v2089_v34 = vpop.eup %2088 }
 0x1eb   : > { %v1041_v32 = vadd.f32 1.0, %v2089_v34  ;;  %v2091_v37 = vpop.eup %2090 }
 0x1ec   : > { %v1042_v35 = vadd.f32 1.0, %v2091_v37  ;;  %v2093_v36 = vpop.eup %2092 }
 0x1ed   : > { %2096 = vrcp.f32 %v1041_v32  ;;  %v2095_v39 = vpop.eup %2094 }
 0x1ee   : > { %2098 = vrcp.f32 %v1042_v35  ;;  %v1043_v47 = vadd.f32 1.0, %v2095_v39 }
 0x1f0   : > { %2100 = vrcp.f32 %v1043_v47 }
 0x1f7   : > { %v2097_v40 = vpop.eup %2096 }
 0x1f8   : > { %v1052_v24 = vmul.f32 %v2097_v40, %v2093_v36  ;;  %v2099_v42 = vpop.eup %2098 }
 0x1f9   : > { %v1051_v48 = vmul.f32 %v2099_v42, %v776_v25 }
 0x1fa   : > { %v2101_v51 = vpop.eup %2100 }
 0x1fb   : > { %v2660_v56 = vadd.f32 %v1052_v24, %v1051_v48 }
 0x1fd   : > { %2102 = vtanh.f32 %v2660_v56 }
 0x207   : > { %v2103_v3 = vpop.eup %2102 }
 0x208   : > { %v2663_v22 = vmul.f32 %v2103_v3, %v2101_v51 }
 0x20a   : > { %v1070_v23 = vpack.c.bf16 %v2663_v22, %v2663_v22 }
 0x20c   : > { %1104 = vmatmul.mubr.bf16.vlgmr.msra.gmra.mrb[12].mxu0 %v1070_v23  ;;  %1145 = vmatmul.mubr.bf16.vlgmr.msra.gmra.mrb[12].mxu1 %v1070_v23 }
 0x20d   : > { %1197 = vmatpush1.bf16.msra.mxu0 %v2502_v52  ;;  %1238 = vmatpush1.bf16.msra.mxu1 %v2504_v53 }
 0x20e   : > { %1198 = vmatprep.subr.bf16.mxu0 %v2506_v54  ;;  %1239 = vmatprep.subr.bf16.mxu1 %v2508_v55 }
 0x20f   : > { %1228 = vmatprep.mubr.bf16.mxu0 %v2829_v29  ;;  %1269 = vmatprep.mubr.bf16.mxu1 %v2829_v29 }
 0x211   : > { %1199 = vmatpush1.bf16.msra.mxu0 %v2512_v57  ;;  %1240 = vmatpush1.bf16.msra.mxu1 %v2514_v58 }
 0x212   : > { %1200 = vmatprep.subr.bf16.mxu0 %v2518_v60  ;;  %1241 = vmatprep.subr.bf16.mxu1 %v2520_v61 }
 0x215   : > { %1201 = vmatpush1.bf16.msra.mxu0 %v2526_v62  ;;  %1242 = vmatpush1.bf16.msra.mxu1 %v2528_v63 }
 0x216   : > { %1202 = vmatprep.subr.bf16.mxu0 %v2532_v0  ;;  %1243 = vmatprep.subr.bf16.mxu1 %v2534_v1 }
 0x219   : > { %1203 = vmatpush1.bf16.msra.mxu0 %v2538_v2  ;;  %1244 = vmatpush1.bf16.msra.mxu1 %v2540_v4 }
 0x21a   : > { %1204 = vmatprep.subr.bf16.mxu0 %v2544_v5  ;;  %1245 = vmatprep.subr.bf16.mxu1 %v2546_v6 }
 0x21d   : > { %1205 = vmatpush1.bf16.msra.mxu0 %v2552_v7  ;;  %1246 = vmatpush1.bf16.msra.mxu1 %v2554_v8 }
 0x21e   : > { %1206 = vmatprep.subr.bf16.mxu0 %v2558_v9  ;;  %1247 = vmatprep.subr.bf16.mxu1 %v2560_v10 }
 0x221   : > { %1207 = vmatpush1.bf16.msra.mxu0 %v2564_v11  ;;  %1248 = vmatpush1.bf16.msra.mxu1 %v2566_v12 }
 0x222   : > { %1208 = vmatprep.subr.bf16.mxu0 %v2570_v13  ;;  %1249 = vmatprep.subr.bf16.mxu1 %v2572_v14 }
 0x225   : > { %1209 = vmatpush1.bf16.msra.mxu0 %v2576_v15  ;;  %1250 = vmatpush1.bf16.msra.mxu1 %v2578_v16 }
 0x226   : > { %1210 = vmatprep.subr.bf16.mxu0 %v2582_v17  ;;  %1251 = vmatprep.subr.bf16.mxu1 %v2584_v18 }
 0x229   : > { %1211 = vmatpush1.bf16.msra.mxu0 %v2588_v19  ;;  %1252 = vmatpush1.bf16.msra.mxu1 %v2590_v20 }
 0x22a   : > { %1321 = vmatprep.subr.bf16.mxu0 %v2495_v44  ;;  %1362 = vmatprep.subr.bf16.mxu1 %v2497_v46 }
 0x2df   : > { %v1105_v26 = vpop.f32.mrb[12].mxu0  ;;  %v1146_v30 = vpop.f32.mrb[12].mxu1 }
 0x2e0   : > { %v1153_v27 = vadd.f32 %v1105_v26, %v2636_v43  ;;  %v1155_v31 = vadd.f32 %v1146_v30, %v2638_v45  ;;  %v1107_v34 = vpop.f32.mrb[13].mxu0  ;;  %v1148_v32 = vpop.f32.mrb[13].mxu1 }
 0x2e1   : > { %v1154_v37 = vadd.f32 %v1107_v34, %v2640_v49  ;;  %v1156_v35 = vadd.f32 %v1148_v32, %v2642_v50  ;;  %v1109_v36 = vpop.f32.mrb[14].mxu0  ;;  %v1150_v39 = vpop.f32.mrb[14].mxu1  ;;  %v777_v34 = vld [vmem:[#allocation4] sm:$0xff] }
 0x2e2   : > { %v1844_v40 = vmul.f32 -1.442695, %v1153_v27  ;;  %v1110_v25 = vpop.f32.mrb[15].mxu0  ;;  %v1151_v24 = vpop.f32.mrb[15].mxu1  ;;  %v1846_v46 = vmul.f32 -1.442695, %v1155_v31 }
 0x2e3   : > { %v1845_v44 = vmul.f32 -1.442695, %v1154_v37  ;;  %v1060_v27 = vpop.permute.xlu0 %1059  ;;  %v1185_v37 = vpop.permute.xlu1 %1184 }
 0x2e4   : > { %2104 = vpow2.f32 %v1844_v40  ;;  %vm1061_vm10 = vcmp.eq.s32.totalorder %v1060_v27, 1  ;;  %vm1186_vm11 = vcmp.eq.s32.totalorder %v1185_v37, 1 }
 0x2e5   : > { %2106 = vpow2.f32 %v1845_v44  ;;  %v1062_v36 = vsel %vm1061_vm10, %v2663_v22, %v777_v34 }
 0x2e6   : > { %2108 = vtanh.f32 %v1156_v35 }
 0x2e7   : > { %2110 = vpow2.f32 %v1846_v46 }
 0x2ee   : > { %v2105_v42 = vpop.eup %2104 }
 0x2ef   : > { %v1166_v47 = vadd.f32 1.0, %v2105_v42  ;;  %v2107_v43 = vpop.eup %2106 }
 0x2f0   : > { %v1167_v45 = vadd.f32 1.0, %v2107_v43  ;;  %v2109_v49 = vpop.eup %2108 }
 0x2f1   : > { %2112 = vrcp.f32 %v1166_v47  ;;  %v2111_v48 = vpop.eup %2110 }
 0x2f2   : > { %2114 = vrcp.f32 %v1167_v45  ;;  %v1168_v23 = vadd.f32 1.0, %v2111_v48 }
 0x2f4   : > { %2116 = vrcp.f32 %v1168_v23 }
 0x2fb   : > { %v2113_v50 = vpop.eup %2112 }
 0x2fc   : > { %v1177_v51 = vmul.f32 %v2113_v50, %v2109_v49  ;;  %v2115_v3 = vpop.eup %2114 }
 0x2fd   : > { %v1176_v26 = vmul.f32 %v2115_v3, %v2660_v56 }
 0x2fe   : > { %v2117_v31 = vpop.eup %2116 }
 0x2ff   : > { %v2706_v30 = vadd.f32 %v1177_v51, %v1176_v26 }
 0x301   : > { %2118 = vtanh.f32 %v2706_v30 }
 0x30b   : > { %v2119_v32 = vpop.eup %2118 }
 0x30c   : > { %v1180_v35 = vmul.f32 %v2119_v32, %v2117_v31 }
 0x30e   : > { %v2710_v39 = vsel %vm1186_vm11, %v1180_v35, %v1062_v36  ;;  %v1195_v40 = vpack.c.bf16 %v1180_v35, %v1180_v35 }
 0x310   : > { %1229 = vmatmul.mubr.bf16.vlgmr.msra.gmra.mrb[16].mxu0 %v1195_v40  ;;  %1270 = vmatmul.mubr.bf16.vlgmr.msra.gmra.mrb[16].mxu1 %v1195_v40  ;;  %v1435_v40 = vpop.permute.xlu1 %1434 }
 0x311   : > { %1322 = vmatpush1.bf16.msra.mxu0 %v2502_v52  ;;  %1363 = vmatpush1.bf16.msra.mxu1 %v2504_v53  ;;  %vm1436_vm13 = vcmp.eq.s32.totalorder %v1435_v40, 1 }
 0x312   : > { %1323 = vmatprep.subr.bf16.mxu0 %v2506_v54  ;;  %1364 = vmatprep.subr.bf16.mxu1 %v2508_v55 }
 0x313   : > { %1353 = vmatprep.mubr.bf16.mxu0 %v2829_v29  ;;  %1394 = vmatprep.mubr.bf16.mxu1 %v2829_v29 }
 0x315   : > { %1324 = vmatpush1.bf16.msra.mxu0 %v2512_v57  ;;  %1365 = vmatpush1.bf16.msra.mxu1 %v2514_v58 }
 0x316   : > { %1325 = vmatprep.subr.bf16.mxu0 %v2518_v60  ;;  %1366 = vmatprep.subr.bf16.mxu1 %v2520_v61  ;;  %v2830_v60 = vld [vmem:[#allocation16_spill] sm:$0xff] }
 0x319   : > { %1326 = vmatpush1.bf16.msra.mxu0 %v2526_v62  ;;  %1367 = vmatpush1.bf16.msra.mxu1 %v2528_v63  ;;  %v2831_v62 = vld [vmem:[#allocation17_spill] sm:$0xff] }
 0x31a   : > { %1327 = vmatprep.subr.bf16.mxu0 %v2532_v0  ;;  %1368 = vmatprep.subr.bf16.mxu1 %v2534_v1 }
 0x31d   : > { %1328 = vmatpush1.bf16.msra.mxu0 %v2538_v2  ;;  %1369 = vmatpush1.bf16.msra.mxu1 %v2540_v4 }
 0x31e   : > { %1329 = vmatprep.subr.bf16.mxu0 %v2544_v5  ;;  %1370 = vmatprep.subr.bf16.mxu1 %v2546_v6 }
 0x321   : > { %1330 = vmatpush1.bf16.msra.mxu0 %v2552_v7  ;;  %1371 = vmatpush1.bf16.msra.mxu1 %v2554_v8 }
 0x322   : > { %1331 = vmatprep.subr.bf16.mxu0 %v2558_v9  ;;  %1372 = vmatprep.subr.bf16.mxu1 %v2560_v10 }
 0x325   : > { %1332 = vmatpush1.bf16.msra.mxu0 %v2564_v11  ;;  %1373 = vmatpush1.bf16.msra.mxu1 %v2566_v12 }
 0x326   : > { %1333 = vmatprep.subr.bf16.mxu0 %v2570_v13  ;;  %1374 = vmatprep.subr.bf16.mxu1 %v2572_v14 }
 0x329   : > { %1334 = vmatpush1.bf16.msra.mxu0 %v2576_v15  ;;  %1375 = vmatpush1.bf16.msra.mxu1 %v2578_v16 }
 0x32a   : > { %1335 = vmatprep.subr.bf16.mxu0 %v2582_v17  ;;  %1376 = vmatprep.subr.bf16.mxu1 %v2584_v18 }
 0x32d   : > { %1336 = vmatpush1.bf16.msra.mxu0 %v2588_v19  ;;  %1377 = vmatpush1.bf16.msra.mxu1 %v2590_v20 }
 0x3e3   : > { %v1230_v52 = vpop.f32.mrb[16].mxu0  ;;  %v1271_v53 = vpop.f32.mrb[16].mxu1 }
 0x3e4   : > { %v1278_v54 = vadd.f32 %v1230_v52, %v2644_v59  ;;  %v1280_v55 = vadd.f32 %v1271_v53, %v2646_v21  ;;  %v1232_v57 = vpop.f32.mrb[17].mxu0  ;;  %v1273_v58 = vpop.f32.mrb[17].mxu1 }
 0x3e5   : > { %v1279_v61 = vadd.f32 %v1232_v57, %v2830_v60  ;;  %v1281_v63 = vadd.f32 %v1273_v58, %v2831_v62  ;;  %v1234_v0 = vpop.f32.mrb[18].mxu0  ;;  %v1275_v1 = vpop.f32.mrb[18].mxu1  ;;  %v2308_v57 = vmov (!%p1853_p3), 0.0   ;;  %v2153_v58 = vld [vmem:[%s2816_s5 + $0x8] sm:$0xff] (!%p1853_p3)   ;;  %v2154_v60 = vld [vmem:[%s2816_s5 + $0x10] sm:$0xff] (!%p1853_p3)   ;;  %v2155_v62 = vld [vmem:[%s2816_s5 + $0x18] sm:$0xff] (!%p1853_p3)  }
 0x3e6   : > { %v1847_v2 = vmul.f32 -1.442695, %v1278_v54  ;;  %v1235_v4 = vpop.f32.mrb[19].mxu0  ;;  %v1276_v5 = vpop.f32.mrb[19].mxu1  ;;  %v1849_v7 = vmul.f32 -1.442695, %v1280_v55  ;;  %1895 = vmatprep.subr.bf16.mxu0 (!%p1853_p3), %v2308_v57  ;;  %1915 = vmatprep.subr.bf16.mxu1 (!%p1853_p3), %v2308_v57 }
 0x3e7   : > { %v1848_v6 = vmul.f32 -1.442695, %v1279_v61  ;;  %v1310_v59 = vpop.permute.xlu0 %1309  ;;  %v2152_v55 = vld [vmem:[%s2816_s5] sm:$0xff] (!%p1853_p3)   ;;  %v2160_v61 = vld [vmem:[#allocation11] sm:$0xff] (!%p1853_p3)   ;;  %v2162_v1 = vld [vmem:[#allocation11 + $0x10] sm:$0xff] (!%p1853_p3)  }
 0x3e8   : > { %2120 = vpow2.f32 %v1847_v2  ;;  %vm1311_vm12 = vcmp.eq.s32.totalorder %v1310_v59, 1  ;;  %v2156_v0 = vld [vmem:[%s2816_s5 + $0x20] sm:$0xff] (!%p1853_p3)   ;;  %v2157_v2 = vld [vmem:[%s2816_s5 + $0x28] sm:$0xff] (!%p1853_p3)   ;;  %v2163_v4 = vld [vmem:[#allocation11 + $0x18] sm:$0xff] (!%p1853_p3)  }
 0x3e9   : > { %2122 = vpow2.f32 %v1848_v6  ;;  %v2158_v5 = vld [vmem:[%s2816_s5 + $0x30] sm:$0xff] (!%p1853_p3)   ;;  %v2164_v6 = vld [vmem:[#allocation11 + $0x20] sm:$0xff] (!%p1853_p3)  }
 0x3ea   : > { %2124 = vtanh.f32 %v1281_v63  ;;  %v2161_v63 = vld [vmem:[#allocation11 + $0x8] sm:$0xff] (!%p1853_p3)  }
 0x3eb   : > { %2126 = vpow2.f32 %v1849_v7  ;;  %v2159_v7 = vld [vmem:[%s2816_s5 + $0x38] sm:$0xff] (!%p1853_p3)  }
 0x3f2   : > { %v2121_v8 = vpop.eup %2120 }
 0x3f3   : > { %v1291_v9 = vadd.f32 1.0, %v2121_v8  ;;  %v2123_v10 = vpop.eup %2122  ;;  %v2165_v8 = vld [vmem:[#allocation11 + $0x28] sm:$0xff] (!%p1853_p3)  }
 0x3f4   : > { %v1292_v11 = vadd.f32 1.0, %v2123_v10  ;;  %v2125_v12 = vpop.eup %2124  ;;  %v2166_v10 = vld [vmem:[#allocation11 + $0x30] sm:$0xff] (!%p1853_p3)  }
 0x3f5   : > { %2128 = vrcp.f32 %v1291_v9  ;;  %v2127_v13 = vpop.eup %2126 }
 0x3f6   : > { %2130 = vrcp.f32 %v1292_v11  ;;  %v1293_v17 = vadd.f32 1.0, %v2127_v13  ;;  %v2167_v11 = vld [vmem:[#allocation11 + $0x38] sm:$0xff] (!%p1853_p3)  }
 0x3f8   : > { %2132 = vrcp.f32 %v1293_v17 }
 0x3ff   : > { %v2129_v14 = vpop.eup %2128 }
 0x400   : > { %v1302_v15 = vmul.f32 %v2129_v14, %v2125_v12  ;;  %v2131_v16 = vpop.eup %2130  ;;  %v1854_v12 = vld [vmem:[%s2817_s6] ss:$0 sm:$0xff] (!%p1853_p3) }
 0x401   : > { %v1301_v18 = vmul.f32 %v2131_v16, %v2706_v30 }
 0x402   : > { %v2133_v20 = vpop.eup %2132 }
 0x403   : > { %v1303_v19 = vadd.f32 %v1302_v15, %v1301_v18 }
 0x405   : > { %2134 = vtanh.f32 %v1303_v19 }
 0x40f   : > { %v2135_v21 = vpop.eup %2134 }
 0x410   : > { %v1305_v56 = vmul.f32 %v2135_v21, %v2133_v20  ;;  %v1863_v20 = vld [vmem:[%s2819_s8] ss:$0 sm:$0xff] (!%p1853_p3) }
 0x412   : > { %v1312_v22 = vsel %vm1311_vm12, %v1305_v56, %v2710_v39  ;;  %v1320_v29 = vpack.c.bf16 %v1305_v56, %v1305_v56 }
 0x414   : > { %1354 = vmatmul.mubr.bf16.vlgmr.msra.gmra.mrb[20].mxu0 %v1320_v29  ;;  %1395 = vmatmul.mubr.bf16.vlgmr.msra.gmra.mrb[20].mxu1 %v1320_v29 }
 0x415   : > { %1896 = vmatpush3.bf16.msra.mxu0 (!%p1853_p3), %v2152_v55  ;;  %1911 = vmatprep.mubr.msk.bf16.mxu0 (!%p1853_p3), %vm2309_vm14, %v2308_v57 }
 0x416   : > { %1897 = vmatprep.subr.bf16.mxu0 (!%p1853_p3), %v2308_v57  ;;  %1931 = vmatprep.mubr.msk.bf16.mxu1 (!%p1853_p3), %vm2309_vm14, %v2308_v57 }
 0x417   : > { %1916 = vmatpush3.bf16.msra.mxu1 (!%p1853_p3), %v2160_v61 }
 0x418   : > { %1917 = vmatprep.subr.bf16.mxu1 (!%p1853_p3), %v2308_v57 }
 0x419   : > { %1898 = vmatpush3.bf16.msra.mxu0 (!%p1853_p3), %v2153_v58 }
 0x41a   : > { %1899 = vmatprep.subr.bf16.mxu0 (!%p1853_p3), %v2308_v57 }
 0x41b   : > { %1918 = vmatpush3.bf16.msra.mxu1 (!%p1853_p3), %v2161_v63 }
 0x41c   : > { %1919 = vmatprep.subr.bf16.mxu1 (!%p1853_p3), %v2308_v57 }
 0x41d   : > { %1900 = vmatpush3.bf16.msra.mxu0 (!%p1853_p3), %v2154_v60 }
 0x41e   : > { %1901 = vmatprep.subr.bf16.mxu0 (!%p1853_p3), %v2308_v57 }
 0x41f   : > { %1920 = vmatpush3.bf16.msra.mxu1 (!%p1853_p3), %v2162_v1 }
 0x420   : > { %1921 = vmatprep.subr.bf16.mxu1 (!%p1853_p3), %v2308_v57 }
 0x421   : > { %1902 = vmatpush3.bf16.msra.mxu0 (!%p1853_p3), %v2155_v62 }
 0x422   : > { %1903 = vmatprep.subr.bf16.mxu0 (!%p1853_p3), %v2308_v57 }
 0x423   : > { %1922 = vmatpush3.bf16.msra.mxu1 (!%p1853_p3), %v2163_v4 }
 0x424   : > { %1923 = vmatprep.subr.bf16.mxu1 (!%p1853_p3), %v2308_v57 }
 0x425   : > { %1904 = vmatpush3.bf16.msra.mxu0 (!%p1853_p3), %v2156_v0 }
 0x426   : > { %1905 = vmatprep.subr.bf16.mxu0 (!%p1853_p3), %v2308_v57 }
 0x427   : > { %1924 = vmatpush3.bf16.msra.mxu1 (!%p1853_p3), %v2164_v6 }
 0x428   : > { %1925 = vmatprep.subr.bf16.mxu1 (!%p1853_p3), %v2308_v57 }
 0x429   : > { %1906 = vmatpush3.bf16.msra.mxu0 (!%p1853_p3), %v2157_v2 }
 0x42a   : > { %1907 = vmatprep.subr.bf16.mxu0 (!%p1853_p3), %v2308_v57 }
 0x42b   : > { %1926 = vmatpush3.bf16.msra.mxu1 (!%p1853_p3), %v2165_v8 }
 0x42c   : > { %1927 = vmatprep.subr.bf16.mxu1 (!%p1853_p3), %v2308_v57 }
 0x42d   : > { %1908 = vmatpush3.bf16.msra.mxu0 (!%p1853_p3), %v2158_v5 }
 0x42e   : > { %1909 = vmatprep.subr.bf16.mxu0 (!%p1853_p3), %v2308_v57 }
 0x42f   : > { %1928 = vmatpush3.bf16.msra.mxu1 (!%p1853_p3), %v2166_v10 }
 0x430   : > { %1929 = vmatprep.subr.bf16.mxu1 (!%p1853_p3), %v2308_v57 }
 0x431   : > { %1910 = vmatpush3.bf16.msra.mxu0 (!%p1853_p3), %v2159_v7 }
 0x433   : > { %1930 = vmatpush3.bf16.msra.mxu1 (!%p1853_p3), %v2167_v11 }
 0x4e7   : > { %v1355_v25 = vpop.f32.mrb[20].mxu0  ;;  %v1396_v24 = vpop.f32.mrb[20].mxu1 }
 0x4e8   : > { %v1403_v44 = vadd.f32 %v1355_v25, %v2652_v28  ;;  %v1405_v46 = vadd.f32 %v1396_v24, %v2654_v33  ;;  %v1357_v42 = vpop.f32.mrb[21].mxu0  ;;  %v1398_v47 = vpop.f32.mrb[21].mxu1 }
 0x4e9   : > { %v1404_v43 = vadd.f32 %v1357_v42, %v2656_v38  ;;  %v1406_v45 = vadd.f32 %v1398_v47, %v2658_v41  ;;  %v1359_v49 = vpop.f32.mrb[22].mxu0  ;;  %v1400_v48 = vpop.f32.mrb[22].mxu1 }
 0x4ea   : > { %v1850_v50 = vmul.f32 -1.442695, %v1403_v44  ;;  %v1360_v51 = vpop.f32.mrb[23].mxu0  ;;  %v1401_v3 = vpop.f32.mrb[23].mxu1  ;;  %v1852_v26 = vmul.f32 -1.442695, %v1405_v46 }
 0x4eb   : > { %v1851_v23 = vmul.f32 -1.442695, %v1404_v43 }
 0x4ec   : > { %2136 = vpow2.f32 %v1850_v50 }
 0x4ed   : > { %2138 = vpow2.f32 %v1851_v23 }
 0x4ee   : > { %2140 = vtanh.f32 %v1406_v45 }
 0x4ef   : > { %2142 = vpow2.f32 %v1852_v26 }
 0x4f6   : > { %v2137_v30 = vpop.eup %2136 }
 0x4f7   : > { %v1416_v27 = vadd.f32 1.0, %v2137_v30  ;;  %v2139_v28 = vpop.eup %2138 }
 0x4f8   : > { %v1417_v33 = vadd.f32 1.0, %v2139_v28  ;;  %v2141_v38 = vpop.eup %2140 }
 0x4f9   : > { %2144 = vrcp.f32 %v1416_v27  ;;  %v2143_v31 = vpop.eup %2142 }
 0x4fa   : > { %2146 = vrcp.f32 %v1417_v33  ;;  %v1418_v37 = vadd.f32 1.0, %v2143_v31 }
 0x4fc   : > { %2148 = vrcp.f32 %v1418_v37 }
 0x503   : > { %v2145_v41 = vpop.eup %2144 }
 0x504   : > { %v1427_v34 = vmul.f32 %v2145_v41, %v2141_v38  ;;  %v2147_v32 = vpop.eup %2146 }
 0x505   : > { %v1426_v35 = vmul.f32 %v2147_v32, %v1303_v19 }
 0x506   : > { %v2149_v39 = vpop.eup %2148 }
 0x507   : > { %v1428_v36 = vadd.f32 %v1427_v34, %v1426_v35 }
 0x509   : > { %2150 = vtanh.f32 %v1428_v36  ;;  %1439 = vst [vmem:[#allocation3] sm:$0xff] %v1428_v36 }
 0x511   : > { %1444 = sbr.rel (%p1853_p3) target bundleno = 1738 (0x6ca), region = 76 }
 0x513   : > { %v2151_v52 = vpop.eup %2150 }
 0x514   : > { %v1430_v53 = vmul.f32 %v2151_v52, %v2149_v39 }
 0x516   : > { %v1437_v54 = vsel %vm1436_vm13, %v1430_v53, %v1312_v22  ;;  %1438 = vst [vmem:[#allocation2] sm:$0xff] %v1430_v53 }
 0x517   : > { %1440 = vst [vmem:[#allocation4] sm:$0xff] %v1437_v54  ;;  %v1445_v9 = vpack.c.bf16 (!%p1853_p3), %v1437_v54, %v1437_v54 }
 0x519   : > { %1912 = vmatmul.mubr.bf16.vlgmr.msra.gmra.mrb[0].mxu0 %v1445_v9 }
 0x5ec   : > { %v1551_v13 = vpop.f32.mrb[0].mxu0 }
 0x5ed   : > { %v1552_v14 = vadd.f32 %v1854_v12, %v1551_v13  ;;  %v1913_v15 = vpop.f32.mrb[1].mxu0 }
 0x5ee   : > { %v1554_v16 = vpop.f32.mrb[2].mxu0 }
 0x5ef   : > { %v1557_v17 = vmax.f32 %v1552_v14, 0.0  ;;  %v1914_v18 = vpop.f32.mrb[3].mxu0 }
 0x5f1   : > { %v1558_v19 = vpack.c.bf16 %v1557_v17, %v1557_v17 }
 0x5f3   : > { %1932 = vmatmul.mubr.bf16.vlgmr.msra.gmra.mrb[0].mxu1 %v1558_v19 }
 0x6c6   : > { %v1664_v59 = vpop.f32.mrb[0].mxu1 }
 0x6c7   : > { %v1665_v21 = vadd.f32 %v1863_v20, %v1664_v59  ;;  %v1933_v56 = vpop.f32.mrb[1].mxu1 }
 0x6c8   : > { %v1667_v22 = vpop.f32.mrb[2].mxu1 }
 0x6c9   : > { %1670 = vst [vmem:[#allocation12] sm:$0xff] %v1665_v21  ;;  %v1934_v29 = vpop.f32.mrb[3].mxu1 }
 0x6ca PF: > { %p1967_p6 = scmp.eq.s32.totalorder %s2367_s10, 1  ;;  %s2310_s20 = smov [#allocation12]  }
 0x6cb   : > { %s1678_s21 = sshll.u32 %s2310_s20, 4  ;;  %s1679_s21 = int_to_ptr.vmem [resolvable:$true] %s1678_s21 }
 0x6cc   : > { %s2252_s22 = scalar_lea.vmem %s1679_s21, 128  ;;  %p2259_p5 = scmp.lt.s32.totalorder %s1679_s21, %s1679_s21 }
 0x6cd   : > { %p2253_p13 = scmp.ne.s32.totalorder %s1679_s21, %s2252_s22  ;;  %p2260_p7 = scmp.lt.s32.totalorder %s2252_s22, %s2252_s22 }
 0x6cf   : > { %p2254_p0 = pnand %p2253_p13, %p1967_p6  ;;  %p2261_p9 = por %p2260_p7, %p2259_p5 }
 0x6d1   : > { %p2255_p1 = pneg %p2254_p0 }
 0x6d3   : > { %p2262_p2 = pnand %p2261_p9, %p2255_p1 }
 0x6d5   : > { %2265 = shalt.err (!%p2262_p2)
}
 0x6d6   : > { %s2266_s29 = scalar_lea.hbm %s2820_s9, 128 }
 0x6d7   : > { %p2267_p10 = scmp.ne.s32.totalorder %s2820_s9, %s2266_s29  ;;  %p2272_p8 = scmp.lt.u32.totalorder %s2266_s29, %s2820_s9 }
 0x6d9   : > { %p2268_p11 = pnand %p2267_p10, %p1967_p6 }
 0x6db   : > { %p2269_p12 = pneg %p2268_p11 }
 0x6dd   : > { %p2274_p4 = pnand %p2272_p8, %p2269_p12 }
 0x6df   : > { %2277 = shalt.err (!%p2274_p4)
}
 0x6e0   : > { %1948 = dma.vmem_to_hbm [thread:$0]  (%p1967_p6), %s1679_s21, 128, %s2820_s9, [#allocation8]  }
 0x6e1   : > { %2291 = dma.done.wait (%p1967_p6), [#allocation8], 128  }
 0x6e2   : > { %2293 = vsyncadd (%p1967_p6), [#allocation8], 4294967168 }
 0x6e3 PF: > { %s22_s30 = sadd.s32 1, %s2296_s30  }
 0x6e4   : > { %p19_p3 = scmp.ge.s32.totalorder %s22_s30, 4  }
 0x6e6   :  { %21 = sbr.rel (!%p19_p3) target bundleno = 3 (0x3), region = 108 }
 0x6ed   :  { %1691 = vsyncpa [#allocation7], 1 }
 0x6ee   :  { %1693 = vsyncpa [#allocation7 + $0x1], 1 }
 0x6ef   :  { %1694 = vsyncpa [#allocation10], 1 }
 0x6f0   :  { %1695 = vsyncpa [#allocation8], 1 }
 0x6f1   :  { %1697 = vsyncpa [#allocation8 + $0x1], 1 }

</bundles_post_ra>
